<compile_context>
chip_gen: v5e
topology: v5e:2x2
jax: 0.10.0
libtpu: 0.0.40
codegen_flags: <defaults>
</compile_context>

<pallas_src>
import math

import jax
import jax.numpy as jnp
from jax import lax
from jax.experimental import pallas as pl
from jax.experimental.pallas import tpu as pltpu


# ------------------------------ GELU ---------------------------------------- #

_GELU_C = math.sqrt(2.0 / math.pi)


def _gelu(x):
    # tanh-approximate GELU (EUP work instead of a VALU erf polynomial).
    return 0.5 * x * (1.0 + jnp.tanh(_GELU_C * (x + 0.044715 * (x * x * x))))


# ------------------------------ kernel -------------------------------------- #

def fused_net_kernel(x_idx_ref, edge_idx_ref, src_ref, dst_ref, bases_ref,
                     atom_emb_ref, bond_emb_ref,
                     wf1_ref, wf2_ref, fb_ref,
                     pre_w_ref, w1_ref, w2_ref, conv_b_ref,
                     wp_ref, bp_ref,
                     o_ref):
    f32 = jnp.float32
    bf16 = jnp.bfloat16

    N = x_idx_ref.shape[1]
    E = src_ref.shape[1]
    A = atom_emb_ref.shape[0]
    B1 = bond_emb_ref.shape[0]
    L = pre_w_ref.shape[0]

    # Per-graph blocks (leading grid dim of size 1 -> index [0]).
    x_idx = x_idx_ref[0]        # (N, 1) int32
    edge_idx = edge_idx_ref[0]  # (E, 1) int32
    src = src_ref[0]            # (E, 1) int32
    dst = dst_ref[0]            # (1, E) int32
    bases_in = bases_ref[0]     # (E, NB) f32

    # ---- Embedding lookups as exact one-hot matmuls (bf16 operands, f32 acc) ----
    atom_oh = (x_idx ==
               lax.broadcasted_iota(jnp.int32, (N, A), 1)).astype(bf16)      # [N, A]
    x = jnp.dot(atom_oh, atom_emb_ref[...], preferred_element_type=f32)      # [N, H] f32

    bond_oh = (edge_idx ==
               lax.broadcasted_iota(jnp.int32, (E, B1), 1)).astype(bf16)     # [E, B1]
    e = jnp.dot(bond_oh, bond_emb_ref[...], preferred_element_type=f32)      # [E, H] f32

    # ---- Graph structure as one-hot matrices (built once per graph) ----
    src_oh = (src ==
              lax.broadcasted_iota(jnp.int32, (E, N), 1)).astype(bf16)       # [E, N]
    dst_ohT = (lax.broadcasted_iota(jnp.int32, (N, E), 0) ==
               dst).astype(bf16)                                             # [N, E]

    # ---- filter_encoder: Linear + GELU, Linear + GELU ----
    bf1 = fb_ref[0:1]
    bf2 = fb_ref[1:2]
    h = _gelu(jnp.dot(bases_in.astype(bf16), wf1_ref[...],
                      preferred_element_type=f32) + bf1)
    bases_f = _gelu(jnp.dot(h.astype(bf16), wf2_ref[...],
                            preferred_element_type=f32) + bf2)               # [E, H] f32

    # ---- Conv layers (stacked weights; BN folded into W/b at prep time) ----
    def layer(l, x_cur):
        cb = conv_b_ref[l]                                                   # (3, H) f32
        x_src = jnp.dot(src_oh, x_cur.astype(bf16),
                        preferred_element_type=f32)                          # [E, H]
        pos_e = x_src + e
        v = _gelu(jnp.dot(pos_e.astype(bf16), pre_w_ref[l],
                          preferred_element_type=f32) + cb[0:1]) * bases_f   # [E, H]
        aggr = jnp.dot(dst_ohT, v.astype(bf16),
                       preferred_element_type=f32)                           # [N, H]
        xr = x_cur + aggr
        h1 = _gelu(jnp.dot(xr.astype(bf16), w1_ref[l],
                           preferred_element_type=f32) + cb[1:2])
        h2 = _gelu(jnp.dot(h1.astype(bf16), w2_ref[l],
                           preferred_element_type=f32) + cb[2:3])
        return xr + h2

    x = lax.fori_loop(0, L, layer, x, unroll=True)

    # ---- SumPooling ('S') over all nodes of this graph + prediction head ----
    hg = jnp.sum(x, axis=0, keepdims=True)                                   # [1, H]
    out = jnp.dot(hg.astype(bf16), wp_ref[...],
                  preferred_element_type=f32) + bp_ref[...]                  # [1, T]
    o_ref[...] = out.reshape(o_ref.shape)


# -------------------------- parameter setup --------------------------------- #

def _linear_params(key, fan_in, fan_out):
    kw, kb = jax.random.split(key)
    bound = 1.0 / math.sqrt(fan_in)
    w = jax.random.uniform(kw, (fan_in, fan_out), jnp.float32, -bound, bound)
    b = jax.random.uniform(kb, (1, fan_out), jnp.float32, -bound, bound)
    return w, b


def _bn_params(key, dim, eps=1e-5):
    kg, kb, km, kv = jax.random.split(key, 4)
    gamma = 1.0 + 0.1 * jax.random.normal(kg, (1, dim), jnp.float32)
    beta = 0.1 * jax.random.normal(kb, (1, dim), jnp.float32)
    mean = 0.1 * jax.random.normal(km, (1, dim), jnp.float32)
    var = 1.0 + jnp.abs(0.1 * jax.random.normal(kv, (1, dim), jnp.float32))
    scale = gamma / jnp.sqrt(var + eps)
    shift = beta - mean * scale
    return scale, shift


def init_params(key, *, hidden, num_tasks, num_basis, atom_dim, bond_dim, layers):
    keys = jax.random.split(key, 8 + 8 * layers)
    it = iter(keys)
    p = {}
    p["atom_emb"] = jax.random.normal(next(it), (atom_dim, hidden), jnp.float32)
    p["bond_emb"] = jax.random.normal(next(it), (bond_dim + 1, hidden), jnp.float32)
    # filter_encoder (linear_filter=False, shared_filter=False):
    p["wf1"], p["bf1"] = _linear_params(next(it), num_basis, hidden)
    p["wf2"], p["bf2"] = _linear_params(next(it), hidden, hidden)
    p["convs"] = []
    for _ in range(layers):
        c = {}
        c["pre_w"], c["pre_b"] = _linear_params(next(it), hidden, hidden)
        c["w1"], c["b1"] = _linear_params(next(it), hidden, hidden)
        c["s1"], c["t1"] = _bn_params(next(it), hidden)
        c["w2"], c["b2"] = _linear_params(next(it), hidden, hidden)
        c["s2"], c["t2"] = _bn_params(next(it), hidden)
        p["convs"].append(c)
    p["wp"], p["bp"] = _linear_params(next(it), hidden, num_tasks)
    return p


def prepare_params(params):
    """Fold eval-mode BN into FFN weights, stack per-layer params, cast matmul
    weights to bf16 (biases stay f32 for f32 elementwise accumulation)."""
    bf16 = jnp.bfloat16
    convs = params["convs"]
    # BN fold: (x@w + b)*s + t == x@(w*s) + (b*s + t)
    conv_b = jnp.stack([
        jnp.concatenate([c["pre_b"],
                         c["b1"] * c["s1"] + c["t1"],
                         c["b2"] * c["s2"] + c["t2"]], axis=0)               # [3, H]
        for c in convs])                                                     # [L, 3, H]
    prep = {
        "atom_emb": params["atom_emb"].astype(bf16),
        "bond_emb": params["bond_emb"].astype(bf16),
        "wf1": params["wf1"].astype(bf16),
        "wf2": params["wf2"].astype(bf16),
        "fb": jnp.concatenate([params["bf1"], params["bf2"]], axis=0),        # [2, H] f32
        "pre_w": jnp.stack([c["pre_w"] for c in convs]).astype(bf16),         # [L, H, H]
        "w1": jnp.stack([c["w1"] * c["s1"] for c in convs]).astype(bf16),
        "w2": jnp.stack([c["w2"] * c["s2"] for c in convs]).astype(bf16),
        "conv_b": conv_b,                                                     # [L, 3, H] f32
        "wp": params["wp"].astype(bf16),
        "bp": params["bp"],                                                   # [1, T] f32
    }
    return prep


# ------------------------------ VMEM sizing ---------------------------------- #

def _tile_bytes(shape, itemsize):
    if len(shape) == 1:
        shape = (1,) + tuple(shape)
    lead = 1
    for d in shape[:-2]:
        lead *= d
    sub = -(-shape[-2] // 8) * 8
    lane = -(-shape[-1] // 128) * 128
    return lead * sub * lane * itemsize


def _vmem_limit_bytes(N, E, A, B1, NB, H, L, T):
    per_graph = (_tile_bytes((N, 1), 4) + 2 * _tile_bytes((E, 1), 4)
                 + _tile_bytes((1, E), 4) + _tile_bytes((E, NB), 4)
                 + _tile_bytes((1, T), 4))
    weights = (_tile_bytes((A, H), 2) + _tile_bytes((B1, H), 2)
               + _tile_bytes((NB, H), 2) + _tile_bytes((H, H), 2)
               + _tile_bytes((2, H), 4)
               + 3 * L * _tile_bytes((H, H), 2) + L * _tile_bytes((3, H), 4)
               + _tile_bytes((H, T), 2) + _tile_bytes((1, T), 4))
    scratch = (_tile_bytes((N, A), 2) + _tile_bytes((E, B1), 2)
               + _tile_bytes((E, N), 2) + _tile_bytes((N, E), 2)
               + 6 * _tile_bytes((E, H), 4) + 6 * _tile_bytes((N, H), 4))
    est = 2 * per_graph + 2 * weights + 4 * scratch      # double-buffer + headroom
    return int(min(max(est, 16 * 1024 * 1024), 48 * 1024 * 1024))


# ------------------------------ forward -------------------------------------- #

def net_forward(prep, src, dst, x_idx, edge_idx, bases):
    B, N = x_idx.shape
    E = src.shape[1]
    H = prep["atom_emb"].shape[1]
    A = prep["atom_emb"].shape[0]
    B1 = prep["bond_emb"].shape[0]
    NB = bases.shape[2]
    L = prep["pre_w"].shape[0]
    T = prep["wp"].shape[1]

    x_idx3 = x_idx.astype(jnp.int32).reshape(B, N, 1)
    edge_idx3 = edge_idx.astype(jnp.int32).reshape(B, E, 1)
    src3 = src.astype(jnp.int32).reshape(B, E, 1)
    dst3 = dst.astype(jnp.int32).reshape(B, 1, E)

    args = (x_idx3, edge_idx3, src3, dst3, bases,
            prep["atom_emb"], prep["bond_emb"],
            prep["wf1"], prep["wf2"], prep["fb"],
            prep["pre_w"], prep["w1"], prep["w2"], prep["conv_b"],
            prep["wp"], prep["bp"])

    in_specs = [
        # per-graph blocks (sliced along the grid axis)
        pl.BlockSpec((1, N, 1), lambda b: (b, 0, 0)),
        pl.BlockSpec((1, E, 1), lambda b: (b, 0, 0)),
        pl.BlockSpec((1, E, 1), lambda b: (b, 0, 0)),
        pl.BlockSpec((1, 1, E), lambda b: (b, 0, 0)),
        pl.BlockSpec((1, E, NB), lambda b: (b, 0, 0)),
        # weights: constant index maps -> DMA'd once, resident across the grid
        pl.BlockSpec((A, H), lambda b: (0, 0)),
        pl.BlockSpec((B1, H), lambda b: (0, 0)),
        pl.BlockSpec((NB, H), lambda b: (0, 0)),
        pl.BlockSpec((H, H), lambda b: (0, 0)),
        pl.BlockSpec((2, H), lambda b: (0, 0)),
        pl.BlockSpec((L, H, H), lambda b: (0, 0, 0)),
        pl.BlockSpec((L, H, H), lambda b: (0, 0, 0)),
        pl.BlockSpec((L, H, H), lambda b: (0, 0, 0)),
        pl.BlockSpec((L, 3, H), lambda b: (0, 0, 0)),
        pl.BlockSpec((H, T), lambda b: (0, 0)),
        pl.BlockSpec((1, T), lambda b: (0, 0)),
    ]

    per_graph_flops = 2 * (N * A * H + E * B1 * H + E * NB * H + E * H * H
                           + L * (E * N * H + E * H * H + N * E * H + 2 * N * H * H)
                           + H * T)
    flops = int(B * per_graph_flops)
    transcendentals = int(B * (2 * E * H + L * (E * H + 2 * N * H)))
    bytes_accessed = int(B * (N + 3 * E + E * NB + T) * 4
                         + (A * H + B1 * H + NB * H + H * H
                            + 3 * L * H * H + H * T) * 2
                         + (2 * H + 3 * L * H + T) * 4)

    out = pl.pallas_call(
        fused_net_kernel,
        out_shape=jax.ShapeDtypeStruct((B, 1, T), jnp.float32),
        grid=(B,),
        in_specs=in_specs,
        out_specs=pl.BlockSpec((1, 1, T), lambda b: (b, 0, 0)),
        compiler_params=pltpu.CompilerParams(
            dimension_semantics=("parallel",),
            vmem_limit_bytes=_vmem_limit_bytes(N, E, A, B1, NB, H, L, T)),
        cost_estimate=pl.CostEstimate(flops=flops,
                                      transcendentals=transcendentals,
                                      bytes_accessed=bytes_accessed),
    )(*args)
    return out.reshape(B, T)


# ------------------------------ reference ------------------------------------ #

def reference_forward(prep, src, dst, x_idx, edge_idx, bases):
    """Plain-JAX mirror of the kernel math (same bf16 dot operands, f32 acc)."""
    f32 = jnp.float32
    bf16 = jnp.bfloat16
    A = prep["atom_emb"].shape[0]
    B1 = prep["bond_emb"].shape[0]
    L = prep["pre_w"].shape[0]

    def dot(a, b):
        return jnp.dot(a.astype(bf16), b.astype(bf16), preferred_element_type=f32)

    def one_graph(src_g, dst_g, x_idx_g, edge_idx_g, bases_g):
        N = x_idx_g.shape[0]
        x = dot(jax.nn.one_hot(x_idx_g, A, dtype=f32), prep["atom_emb"])
        e = dot(jax.nn.one_hot(edge_idx_g, B1, dtype=f32), prep["bond_emb"])
        src_oh = jax.nn.one_hot(src_g, N, dtype=f32)
        dst_oh = jax.nn.one_hot(dst_g, N, dtype=f32)
        h = _gelu(dot(bases_g, prep["wf1"]) + prep["fb"][0:1])
        bases_f = _gelu(dot(h, prep["wf2"]) + prep["fb"][1:2])
        for l in range(L):
            cb = prep["conv_b"][l]
            pos_e = dot(src_oh, x) + e
            v = _gelu(dot(pos_e, prep["pre_w"][l]) + cb[0:1]) * bases_f
            aggr = dot(dst_oh.T, v)
            xr = x + aggr
            h1 = _gelu(dot(xr, prep["w1"][l]) + cb[1:2])
            h2 = _gelu(dot(h1, prep["w2"][l]) + cb[2:3])
            x = xr + h2
        hg = jnp.sum(x, axis=0, keepdims=True)
        return (dot(hg, prep["wp"]) + prep["bp"])[0]

    return jax.vmap(one_graph)(src, dst, x_idx, edge_idx, bases)


# -------------------------------- main ---------------------------------------- #

if __name__ == "__main__":
    # Small config consistent with the module; B_GRAPHS graphs per kernel call.
    B_GRAPHS = 8
    HIDDEN = 32
    LAYERS = 2
    NUM_TASKS = 1
    NUM_BASIS = 8
    ATOM_DIM = 10
    BOND_DIM = 5
    N_NODES = 16
    N_EDGES = 32

    key = jax.random.PRNGKey(0)
    k_par, k_src, k_dst, k_x, k_e, k_b = jax.random.split(key, 6)

    params = init_params(k_par, hidden=HIDDEN, num_tasks=NUM_TASKS,
                         num_basis=NUM_BASIS, atom_dim=ATOM_DIM,
                         bond_dim=BOND_DIM, layers=LAYERS)
    prep = prepare_params(params)

    src = jax.random.randint(k_src, (B_GRAPHS, N_EDGES), 0, N_NODES)
    dst = jax.random.randint(k_dst, (B_GRAPHS, N_EDGES), 0, N_NODES)
    x_idx = jax.random.randint(k_x, (B_GRAPHS, N_NODES), 0, ATOM_DIM)
    edge_idx = jax.random.randint(k_e, (B_GRAPHS, N_EDGES), 0, BOND_DIM + 1)
    bases = jax.random.normal(k_b, (B_GRAPHS, N_EDGES, NUM_BASIS), jnp.float32)

    fwd = jax.jit(net_forward)
    out = fwd(prep, src, dst, x_idx, edge_idx, bases)
    jax.block_until_ready(out)
    assert out.shape == (B_GRAPHS, NUM_TASKS)
    assert bool(jnp.all(jnp.isfinite(out)))

    ref = reference_forward(prep, src, dst, x_idx, edge_idx, bases)
    max_err = float(jnp.max(jnp.abs(out - ref)))
    scale = float(jnp.max(jnp.abs(ref))) + 1.0
    assert max_err <= 5e-2 * scale, f"mismatch: max_err={max_err}, scale={scale}"

    print("KERNEL_OK")
</pallas_src>

<mosaic_0001>
module attributes {stable_mosaic.version = 11 : i64} {
  func.func @fused_net_kernel(%arg0: i32, %arg1: memref<1x16x1xi32, #tpu.memory_space<vmem>>, %arg2: memref<1x32x1xi32, #tpu.memory_space<vmem>>, %arg3: memref<1x32x1xi32, #tpu.memory_space<vmem>>, %arg4: memref<1x1x32xi32, #tpu.memory_space<vmem>>, %arg5: memref<1x32x8xf32, #tpu.memory_space<vmem>>, %arg6: memref<10x32xbf16, #tpu.memory_space<vmem>>, %arg7: memref<6x32xbf16, #tpu.memory_space<vmem>>, %arg8: memref<8x32xbf16, #tpu.memory_space<vmem>>, %arg9: memref<32x32xbf16, #tpu.memory_space<vmem>>, %arg10: memref<2x32xf32, #tpu.memory_space<vmem>>, %arg11: memref<2x32x32xbf16, #tpu.memory_space<vmem>>, %arg12: memref<2x32x32xbf16, #tpu.memory_space<vmem>>, %arg13: memref<2x32x32xbf16, #tpu.memory_space<vmem>>, %arg14: memref<2x3x32xf32, #tpu.memory_space<vmem>>, %arg15: memref<32x1xbf16, #tpu.memory_space<vmem>>, %arg16: memref<1x1xf32, #tpu.memory_space<vmem>>, %arg17: memref<1x1x1xf32, #tpu.memory_space<vmem>>) attributes {dimension_semantics = [#tpu.dimension_semantics<parallel>], iteration_bounds = array<i64: 8>, scalar_prefetch = 0 : i64, scratch_operands = 0 : i64, tpu.core_type = #tpu.core_type<tc>, window_params = [{transform_indices = @transform_0, window_bounds = array<i64: 1, 16, 1>}, {transform_indices = @transform_1, window_bounds = array<i64: 1, 32, 1>}, {transform_indices = @transform_2, window_bounds = array<i64: 1, 32, 1>}, {transform_indices = @transform_3, window_bounds = array<i64: 1, 1, 32>}, {transform_indices = @transform_4, window_bounds = array<i64: 1, 32, 8>}, {pipeline_mode = #tpu.pipeline_mode<synchronous>, transform_indices = @transform_5, window_bounds = array<i64: 10, 32>}, {pipeline_mode = #tpu.pipeline_mode<synchronous>, transform_indices = @transform_6, window_bounds = array<i64: 6, 32>}, {pipeline_mode = #tpu.pipeline_mode<synchronous>, transform_indices = @transform_7, window_bounds = array<i64: 8, 32>}, {pipeline_mode = #tpu.pipeline_mode<synchronous>, transform_indices = @transform_8, window_bounds = array<i64: 32, 32>}, {pipeline_mode = #tpu.pipeline_mode<synchronous>, transform_indices = @transform_9, window_bounds = array<i64: 2, 32>}, {pipeline_mode = #tpu.pipeline_mode<synchronous>, transform_indices = @transform_10, window_bounds = array<i64: 2, 32, 32>}, {pipeline_mode = #tpu.pipeline_mode<synchronous>, transform_indices = @transform_11, window_bounds = array<i64: 2, 32, 32>}, {pipeline_mode = #tpu.pipeline_mode<synchronous>, transform_indices = @transform_12, window_bounds = array<i64: 2, 32, 32>}, {pipeline_mode = #tpu.pipeline_mode<synchronous>, transform_indices = @transform_13, window_bounds = array<i64: 2, 3, 32>}, {pipeline_mode = #tpu.pipeline_mode<synchronous>, transform_indices = @transform_14, window_bounds = array<i64: 32, 1>}, {pipeline_mode = #tpu.pipeline_mode<synchronous>, transform_indices = @transform_15, window_bounds = array<i64: 1, 1>}, {transform_indices = @transform_16, window_bounds = array<i64: 1, 1, 1>}]} {
    %c0 = arith.constant 0 : index
    %c0_0 = arith.constant 0 : index
    %c0_1 = arith.constant 0 : index
    %0 = vector.load %arg1[%c0, %c0_0, %c0_1] : memref<1x16x1xi32, #tpu.memory_space<vmem>>, vector<1x16x1xi32>
    %1 = vector.shape_cast %0 : vector<1x16x1xi32> to vector<16x1xi32>
    %c0_2 = arith.constant 0 : index
    %c0_3 = arith.constant 0 : index
    %c0_4 = arith.constant 0 : index
    %2 = vector.load %arg2[%c0_2, %c0_3, %c0_4] : memref<1x32x1xi32, #tpu.memory_space<vmem>>, vector<1x32x1xi32>
    %3 = vector.shape_cast %2 : vector<1x32x1xi32> to vector<32x1xi32>
    %c0_5 = arith.constant 0 : index
    %c0_6 = arith.constant 0 : index
    %c0_7 = arith.constant 0 : index
    %4 = vector.load %arg3[%c0_5, %c0_6, %c0_7] : memref<1x32x1xi32, #tpu.memory_space<vmem>>, vector<1x32x1xi32>
    %5 = vector.shape_cast %4 : vector<1x32x1xi32> to vector<32x1xi32>
    %c0_8 = arith.constant 0 : index
    %c0_9 = arith.constant 0 : index
    %c0_10 = arith.constant 0 : index
    %6 = vector.load %arg4[%c0_8, %c0_9, %c0_10] : memref<1x1x32xi32, #tpu.memory_space<vmem>>, vector<1x1x32xi32>
    %7 = vector.shape_cast %6 : vector<1x1x32xi32> to vector<1x32xi32>
    %c0_11 = arith.constant 0 : index
    %c0_12 = arith.constant 0 : index
    %c0_13 = arith.constant 0 : index
    %8 = vector.load %arg5[%c0_11, %c0_12, %c0_13] : memref<1x32x8xf32, #tpu.memory_space<vmem>>, vector<1x32x8xf32>
    %9 = vector.shape_cast %8 : vector<1x32x8xf32> to vector<32x8xf32>
    %10 = tpu.iota {dimensions = array<i32: 1>} : vector<16x10xi32>
    %11 = vector.broadcast %1 : vector<16x1xi32> to vector<16x10xi32>
    %12 = arith.cmpi eq, %11, %10 : vector<16x10xi32>
    %13 = arith.extui %12 : vector<16x10xi1> to vector<16x10xi32>
    %14 = arith.sitofp %13 : vector<16x10xi32> to vector<16x10xf32>
    %15 = arith.truncf %14 : vector<16x10xf32> to vector<16x10xbf16>
    %c0_14 = arith.constant 0 : index
    %c0_15 = arith.constant 0 : index
    %16 = vector.load %arg6[%c0_14, %c0_15] : memref<10x32xbf16, #tpu.memory_space<vmem>>, vector<10x32xbf16>
    %cst = arith.constant dense<0.000000e+00> : vector<16x32xf32>
    %17 = tpu.matmul %15, %16, %cst {dimension_numbers = #tpu.dot_dimension_numbers<[1], [0], [0], [1], [0, 0, 1, 1], [], []>} : vector<16x10xbf16>, vector<10x32xbf16>, vector<16x32xf32> -> vector<16x32xf32>
    %18 = tpu.iota {dimensions = array<i32: 1>} : vector<32x6xi32>
    %19 = vector.broadcast %3 : vector<32x1xi32> to vector<32x6xi32>
    %20 = arith.cmpi eq, %19, %18 : vector<32x6xi32>
    %21 = arith.extui %20 : vector<32x6xi1> to vector<32x6xi32>
    %22 = arith.sitofp %21 : vector<32x6xi32> to vector<32x6xf32>
    %23 = arith.truncf %22 : vector<32x6xf32> to vector<32x6xbf16>
    %c0_16 = arith.constant 0 : index
    %c0_17 = arith.constant 0 : index
    %24 = vector.load %arg7[%c0_16, %c0_17] : memref<6x32xbf16, #tpu.memory_space<vmem>>, vector<6x32xbf16>
    %cst_18 = arith.constant dense<0.000000e+00> : vector<32x32xf32>
    %25 = tpu.matmul %23, %24, %cst_18 {dimension_numbers = #tpu.dot_dimension_numbers<[1], [0], [0], [1], [0, 0, 1, 1], [], []>} : vector<32x6xbf16>, vector<6x32xbf16>, vector<32x32xf32> -> vector<32x32xf32>
    %26 = tpu.iota {dimensions = array<i32: 1>} : vector<32x16xi32>
    %27 = vector.broadcast %5 : vector<32x1xi32> to vector<32x16xi32>
    %28 = arith.cmpi eq, %27, %26 : vector<32x16xi32>
    %29 = arith.extui %28 : vector<32x16xi1> to vector<32x16xi32>
    %30 = arith.sitofp %29 : vector<32x16xi32> to vector<32x16xf32>
    %31 = arith.truncf %30 : vector<32x16xf32> to vector<32x16xbf16>
    %32 = tpu.iota {dimensions = array<i32: 0>} : vector<16x32xi32>
    %33 = vector.broadcast %7 : vector<1x32xi32> to vector<16x32xi32>
    %34 = arith.cmpi eq, %32, %33 : vector<16x32xi32>
    %35 = arith.extui %34 : vector<16x32xi1> to vector<16x32xi32>
    %36 = arith.sitofp %35 : vector<16x32xi32> to vector<16x32xf32>
    %37 = arith.truncf %36 : vector<16x32xf32> to vector<16x32xbf16>
    %c0_19 = arith.constant 0 : index
    %c0_20 = arith.constant 0 : index
    %38 = vector.load %arg10[%c0_19, %c0_20] : memref<2x32xf32, #tpu.memory_space<vmem>>, vector<1x32xf32>
    %c1 = arith.constant 1 : index
    %c0_21 = arith.constant 0 : index
    %39 = vector.load %arg10[%c1, %c0_21] : memref<2x32xf32, #tpu.memory_space<vmem>>, vector<1x32xf32>
    %40 = arith.truncf %9 : vector<32x8xf32> to vector<32x8xbf16>
    %c0_22 = arith.constant 0 : index
    %c0_23 = arith.constant 0 : index
    %41 = vector.load %arg8[%c0_22, %c0_23] : memref<8x32xbf16, #tpu.memory_space<vmem>>, vector<8x32xbf16>
    %cst_24 = arith.constant dense<0.000000e+00> : vector<32x32xf32>
    %42 = tpu.matmul %40, %41, %cst_24 {dimension_numbers = #tpu.dot_dimension_numbers<[1], [0], [0], [1], [0, 0, 1, 1], [], []>} : vector<32x8xbf16>, vector<8x32xbf16>, vector<32x32xf32> -> vector<32x32xf32>
    %43 = vector.broadcast %38 : vector<1x32xf32> to vector<32x32xf32>
    %44 = arith.addf %42, %43 : vector<32x32xf32>
    %cst_25 = arith.constant 5.000000e-01 : f32
    %45 = vector.broadcast %cst_25 : f32 to vector<32x32xf32>
    %46 = arith.mulf %45, %44 : vector<32x32xf32>
    %47 = arith.mulf %44, %44 : vector<32x32xf32>
    %48 = arith.mulf %47, %44 : vector<32x32xf32>
    %cst_26 = arith.constant 4.471500e-02 : f32
    %49 = vector.broadcast %cst_26 : f32 to vector<32x32xf32>
    %50 = arith.mulf %49, %48 : vector<32x32xf32>
    %51 = arith.addf %44, %50 : vector<32x32xf32>
    %cst_27 = arith.constant 0.797884583 : f32
    %52 = vector.broadcast %cst_27 : f32 to vector<32x32xf32>
    %53 = arith.mulf %52, %51 : vector<32x32xf32>
    %54 = math.tanh %53 : vector<32x32xf32>
    %cst_28 = arith.constant 1.000000e+00 : f32
    %55 = vector.broadcast %cst_28 : f32 to vector<32x32xf32>
    %56 = arith.addf %55, %54 : vector<32x32xf32>
    %57 = arith.mulf %46, %56 : vector<32x32xf32>
    %58 = arith.truncf %57 : vector<32x32xf32> to vector<32x32xbf16>
    %c0_29 = arith.constant 0 : index
    %c0_30 = arith.constant 0 : index
    %59 = vector.load %arg9[%c0_29, %c0_30] : memref<32x32xbf16, #tpu.memory_space<vmem>>, vector<32x32xbf16>
    %cst_31 = arith.constant dense<0.000000e+00> : vector<32x32xf32>
    %60 = tpu.matmul %58, %59, %cst_31 {dimension_numbers = #tpu.dot_dimension_numbers<[1], [0], [0], [1], [0, 0, 1, 1], [], []>} : vector<32x32xbf16>, vector<32x32xbf16>, vector<32x32xf32> -> vector<32x32xf32>
    %61 = vector.broadcast %39 : vector<1x32xf32> to vector<32x32xf32>
    %62 = arith.addf %60, %61 : vector<32x32xf32>
    %cst_32 = arith.constant 5.000000e-01 : f32
    %63 = vector.broadcast %cst_32 : f32 to vector<32x32xf32>
    %64 = arith.mulf %63, %62 : vector<32x32xf32>
    %65 = arith.mulf %62, %62 : vector<32x32xf32>
    %66 = arith.mulf %65, %62 : vector<32x32xf32>
    %cst_33 = arith.constant 4.471500e-02 : f32
    %67 = vector.broadcast %cst_33 : f32 to vector<32x32xf32>
    %68 = arith.mulf %67, %66 : vector<32x32xf32>
    %69 = arith.addf %62, %68 : vector<32x32xf32>
    %cst_34 = arith.constant 0.797884583 : f32
    %70 = vector.broadcast %cst_34 : f32 to vector<32x32xf32>
    %71 = arith.mulf %70, %69 : vector<32x32xf32>
    %72 = math.tanh %71 : vector<32x32xf32>
    %cst_35 = arith.constant 1.000000e+00 : f32
    %73 = vector.broadcast %cst_35 : f32 to vector<32x32xf32>
    %74 = arith.addf %73, %72 : vector<32x32xf32>
    %75 = arith.mulf %64, %74 : vector<32x32xf32>
    %c0_i32 = arith.constant 0 : i32
    %76 = arith.index_cast %c0_i32 : i32 to index
    %c0_36 = arith.constant 0 : index
    %c0_37 = arith.constant 0 : index
    %77 = vector.load %arg14[%76, %c0_36, %c0_37] : memref<2x3x32xf32, #tpu.memory_space<vmem>>, vector<1x3x32xf32>
    %78 = vector.shape_cast %77 : vector<1x3x32xf32> to vector<3x32xf32>
    %79 = arith.truncf %17 : vector<16x32xf32> to vector<16x32xbf16>
    %cst_38 = arith.constant dense<0.000000e+00> : vector<32x32xf32>
    %80 = tpu.matmul %31, %79, %cst_38 {dimension_numbers = #tpu.dot_dimension_numbers<[1], [0], [0], [1], [0, 0, 1, 1], [], []>} : vector<32x16xbf16>, vector<16x32xbf16>, vector<32x32xf32> -> vector<32x32xf32>
    %81 = arith.addf %80, %25 : vector<32x32xf32>
    %82 = arith.truncf %81 : vector<32x32xf32> to vector<32x32xbf16>
    %83 = arith.index_cast %c0_i32 : i32 to index
    %c0_39 = arith.constant 0 : index
    %c0_40 = arith.constant 0 : index
    %84 = vector.load %arg11[%83, %c0_39, %c0_40] : memref<2x32x32xbf16, #tpu.memory_space<vmem>>, vector<1x32x32xbf16>
    %85 = vector.shape_cast %84 : vector<1x32x32xbf16> to vector<32x32xbf16>
    %cst_41 = arith.constant dense<0.000000e+00> : vector<32x32xf32>
    %86 = tpu.matmul %82, %85, %cst_41 {dimension_numbers = #tpu.dot_dimension_numbers<[1], [0], [0], [1], [0, 0, 1, 1], [], []>} : vector<32x32xbf16>, vector<32x32xbf16>, vector<32x32xf32> -> vector<32x32xf32>
    %87 = vector.extract_strided_slice %78 {offsets = [0, 0], sizes = [1, 32], strides = [1, 1]} : vector<3x32xf32> to vector<1x32xf32>
    %88 = vector.broadcast %87 : vector<1x32xf32> to vector<32x32xf32>
    %89 = arith.addf %86, %88 : vector<32x32xf32>
    %cst_42 = arith.constant 5.000000e-01 : f32
    %90 = vector.broadcast %cst_42 : f32 to vector<32x32xf32>
    %91 = arith.mulf %90, %89 : vector<32x32xf32>
    %92 = arith.mulf %89, %89 : vector<32x32xf32>
    %93 = arith.mulf %92, %89 : vector<32x32xf32>
    %cst_43 = arith.constant 4.471500e-02 : f32
    %94 = vector.broadcast %cst_43 : f32 to vector<32x32xf32>
    %95 = arith.mulf %94, %93 : vector<32x32xf32>
    %96 = arith.addf %89, %95 : vector<32x32xf32>
    %cst_44 = arith.constant 0.797884583 : f32
    %97 = vector.broadcast %cst_44 : f32 to vector<32x32xf32>
    %98 = arith.mulf %97, %96 : vector<32x32xf32>
    %99 = math.tanh %98 : vector<32x32xf32>
    %cst_45 = arith.constant 1.000000e+00 : f32
    %100 = vector.broadcast %cst_45 : f32 to vector<32x32xf32>
    %101 = arith.addf %100, %99 : vector<32x32xf32>
    %102 = arith.mulf %91, %101 : vector<32x32xf32>
    %103 = arith.mulf %102, %75 : vector<32x32xf32>
    %104 = arith.truncf %103 : vector<32x32xf32> to vector<32x32xbf16>
    %cst_46 = arith.constant dense<0.000000e+00> : vector<16x32xf32>
    %105 = tpu.matmul %37, %104, %cst_46 {dimension_numbers = #tpu.dot_dimension_numbers<[1], [0], [0], [1], [0, 0, 1, 1], [], []>} : vector<16x32xbf16>, vector<32x32xbf16>, vector<16x32xf32> -> vector<16x32xf32>
    %106 = arith.addf %17, %105 : vector<16x32xf32>
    %107 = arith.truncf %106 : vector<16x32xf32> to vector<16x32xbf16>
    %108 = arith.index_cast %c0_i32 : i32 to index
    %c0_47 = arith.constant 0 : index
    %c0_48 = arith.constant 0 : index
    %109 = vector.load %arg12[%108, %c0_47, %c0_48] : memref<2x32x32xbf16, #tpu.memory_space<vmem>>, vector<1x32x32xbf16>
    %110 = vector.shape_cast %109 : vector<1x32x32xbf16> to vector<32x32xbf16>
    %cst_49 = arith.constant dense<0.000000e+00> : vector<16x32xf32>
    %111 = tpu.matmul %107, %110, %cst_49 {dimension_numbers = #tpu.dot_dimension_numbers<[1], [0], [0], [1], [0, 0, 1, 1], [], []>} : vector<16x32xbf16>, vector<32x32xbf16>, vector<16x32xf32> -> vector<16x32xf32>
    %112 = vector.extract_strided_slice %78 {offsets = [1, 0], sizes = [1, 32], strides = [1, 1]} : vector<3x32xf32> to vector<1x32xf32>
    %113 = vector.broadcast %112 : vector<1x32xf32> to vector<16x32xf32>
    %114 = arith.addf %111, %113 : vector<16x32xf32>
    %cst_50 = arith.constant 5.000000e-01 : f32
    %115 = vector.broadcast %cst_50 : f32 to vector<16x32xf32>
    %116 = arith.mulf %115, %114 : vector<16x32xf32>
    %117 = arith.mulf %114, %114 : vector<16x32xf32>
    %118 = arith.mulf %117, %114 : vector<16x32xf32>
    %cst_51 = arith.constant 4.471500e-02 : f32
    %119 = vector.broadcast %cst_51 : f32 to vector<16x32xf32>
    %120 = arith.mulf %119, %118 : vector<16x32xf32>
    %121 = arith.addf %114, %120 : vector<16x32xf32>
    %cst_52 = arith.constant 0.797884583 : f32
    %122 = vector.broadcast %cst_52 : f32 to vector<16x32xf32>
    %123 = arith.mulf %122, %121 : vector<16x32xf32>
    %124 = math.tanh %123 : vector<16x32xf32>
    %cst_53 = arith.constant 1.000000e+00 : f32
    %125 = vector.broadcast %cst_53 : f32 to vector<16x32xf32>
    %126 = arith.addf %125, %124 : vector<16x32xf32>
    %127 = arith.mulf %116, %126 : vector<16x32xf32>
    %128 = arith.truncf %127 : vector<16x32xf32> to vector<16x32xbf16>
    %129 = arith.index_cast %c0_i32 : i32 to index
    %c0_54 = arith.constant 0 : index
    %c0_55 = arith.constant 0 : index
    %130 = vector.load %arg13[%129, %c0_54, %c0_55] : memref<2x32x32xbf16, #tpu.memory_space<vmem>>, vector<1x32x32xbf16>
    %131 = vector.shape_cast %130 : vector<1x32x32xbf16> to vector<32x32xbf16>
    %cst_56 = arith.constant dense<0.000000e+00> : vector<16x32xf32>
    %132 = tpu.matmul %128, %131, %cst_56 {dimension_numbers = #tpu.dot_dimension_numbers<[1], [0], [0], [1], [0, 0, 1, 1], [], []>} : vector<16x32xbf16>, vector<32x32xbf16>, vector<16x32xf32> -> vector<16x32xf32>
    %133 = vector.extract_strided_slice %78 {offsets = [2, 0], sizes = [1, 32], strides = [1, 1]} : vector<3x32xf32> to vector<1x32xf32>
    %134 = vector.broadcast %133 : vector<1x32xf32> to vector<16x32xf32>
    %135 = arith.addf %132, %134 : vector<16x32xf32>
    %cst_57 = arith.constant 5.000000e-01 : f32
    %136 = vector.broadcast %cst_57 : f32 to vector<16x32xf32>
    %137 = arith.mulf %136, %135 : vector<16x32xf32>
    %138 = arith.mulf %135, %135 : vector<16x32xf32>
    %139 = arith.mulf %138, %135 : vector<16x32xf32>
    %cst_58 = arith.constant 4.471500e-02 : f32
    %140 = vector.broadcast %cst_58 : f32 to vector<16x32xf32>
    %141 = arith.mulf %140, %139 : vector<16x32xf32>
    %142 = arith.addf %135, %141 : vector<16x32xf32>
    %cst_59 = arith.constant 0.797884583 : f32
    %143 = vector.broadcast %cst_59 : f32 to vector<16x32xf32>
    %144 = arith.mulf %143, %142 : vector<16x32xf32>
    %145 = math.tanh %144 : vector<16x32xf32>
    %cst_60 = arith.constant 1.000000e+00 : f32
    %146 = vector.broadcast %cst_60 : f32 to vector<16x32xf32>
    %147 = arith.addf %146, %145 : vector<16x32xf32>
    %148 = arith.mulf %137, %147 : vector<16x32xf32>
    %149 = arith.addf %106, %148 : vector<16x32xf32>
    %c1_i32 = arith.constant 1 : i32
    %150 = arith.index_cast %c1_i32 : i32 to index
    %c0_61 = arith.constant 0 : index
    %c0_62 = arith.constant 0 : index
    %151 = vector.load %arg14[%150, %c0_61, %c0_62] : memref<2x3x32xf32, #tpu.memory_space<vmem>>, vector<1x3x32xf32>
    %152 = vector.shape_cast %151 : vector<1x3x32xf32> to vector<3x32xf32>
    %153 = arith.truncf %149 : vector<16x32xf32> to vector<16x32xbf16>
    %cst_63 = arith.constant dense<0.000000e+00> : vector<32x32xf32>
    %154 = tpu.matmul %31, %153, %cst_63 {dimension_numbers = #tpu.dot_dimension_numbers<[1], [0], [0], [1], [0, 0, 1, 1], [], []>} : vector<32x16xbf16>, vector<16x32xbf16>, vector<32x32xf32> -> vector<32x32xf32>
    %155 = arith.addf %154, %25 : vector<32x32xf32>
    %156 = arith.truncf %155 : vector<32x32xf32> to vector<32x32xbf16>
    %157 = arith.index_cast %c1_i32 : i32 to index
    %c0_64 = arith.constant 0 : index
    %c0_65 = arith.constant 0 : index
    %158 = vector.load %arg11[%157, %c0_64, %c0_65] : memref<2x32x32xbf16, #tpu.memory_space<vmem>>, vector<1x32x32xbf16>
    %159 = vector.shape_cast %158 : vector<1x32x32xbf16> to vector<32x32xbf16>
    %cst_66 = arith.constant dense<0.000000e+00> : vector<32x32xf32>
    %160 = tpu.matmul %156, %159, %cst_66 {dimension_numbers = #tpu.dot_dimension_numbers<[1], [0], [0], [1], [0, 0, 1, 1], [], []>} : vector<32x32xbf16>, vector<32x32xbf16>, vector<32x32xf32> -> vector<32x32xf32>
    %161 = vector.extract_strided_slice %152 {offsets = [0, 0], sizes = [1, 32], strides = [1, 1]} : vector<3x32xf32> to vector<1x32xf32>
    %162 = vector.broadcast %161 : vector<1x32xf32> to vector<32x32xf32>
    %163 = arith.addf %160, %162 : vector<32x32xf32>
    %cst_67 = arith.constant 5.000000e-01 : f32
    %164 = vector.broadcast %cst_67 : f32 to vector<32x32xf32>
    %165 = arith.mulf %164, %163 : vector<32x32xf32>
    %166 = arith.mulf %163, %163 : vector<32x32xf32>
    %167 = arith.mulf %166, %163 : vector<32x32xf32>
    %cst_68 = arith.constant 4.471500e-02 : f32
    %168 = vector.broadcast %cst_68 : f32 to vector<32x32xf32>
    %169 = arith.mulf %168, %167 : vector<32x32xf32>
    %170 = arith.addf %163, %169 : vector<32x32xf32>
    %cst_69 = arith.constant 0.797884583 : f32
    %171 = vector.broadcast %cst_69 : f32 to vector<32x32xf32>
    %172 = arith.mulf %171, %170 : vector<32x32xf32>
    %173 = math.tanh %172 : vector<32x32xf32>
    %cst_70 = arith.constant 1.000000e+00 : f32
    %174 = vector.broadcast %cst_70 : f32 to vector<32x32xf32>
    %175 = arith.addf %174, %173 : vector<32x32xf32>
    %176 = arith.mulf %165, %175 : vector<32x32xf32>
    %177 = arith.mulf %176, %75 : vector<32x32xf32>
    %178 = arith.truncf %177 : vector<32x32xf32> to vector<32x32xbf16>
    %cst_71 = arith.constant dense<0.000000e+00> : vector<16x32xf32>
    %179 = tpu.matmul %37, %178, %cst_71 {dimension_numbers = #tpu.dot_dimension_numbers<[1], [0], [0], [1], [0, 0, 1, 1], [], []>} : vector<16x32xbf16>, vector<32x32xbf16>, vector<16x32xf32> -> vector<16x32xf32>
    %180 = arith.addf %149, %179 : vector<16x32xf32>
    %181 = arith.truncf %180 : vector<16x32xf32> to vector<16x32xbf16>
    %182 = arith.index_cast %c1_i32 : i32 to index
    %c0_72 = arith.constant 0 : index
    %c0_73 = arith.constant 0 : index
    %183 = vector.load %arg12[%182, %c0_72, %c0_73] : memref<2x32x32xbf16, #tpu.memory_space<vmem>>, vector<1x32x32xbf16>
    %184 = vector.shape_cast %183 : vector<1x32x32xbf16> to vector<32x32xbf16>
    %cst_74 = arith.constant dense<0.000000e+00> : vector<16x32xf32>
    %185 = tpu.matmul %181, %184, %cst_74 {dimension_numbers = #tpu.dot_dimension_numbers<[1], [0], [0], [1], [0, 0, 1, 1], [], []>} : vector<16x32xbf16>, vector<32x32xbf16>, vector<16x32xf32> -> vector<16x32xf32>
    %186 = vector.extract_strided_slice %152 {offsets = [1, 0], sizes = [1, 32], strides = [1, 1]} : vector<3x32xf32> to vector<1x32xf32>
    %187 = vector.broadcast %186 : vector<1x32xf32> to vector<16x32xf32>
    %188 = arith.addf %185, %187 : vector<16x32xf32>
    %cst_75 = arith.constant 5.000000e-01 : f32
    %189 = vector.broadcast %cst_75 : f32 to vector<16x32xf32>
    %190 = arith.mulf %189, %188 : vector<16x32xf32>
    %191 = arith.mulf %188, %188 : vector<16x32xf32>
    %192 = arith.mulf %191, %188 : vector<16x32xf32>
    %cst_76 = arith.constant 4.471500e-02 : f32
    %193 = vector.broadcast %cst_76 : f32 to vector<16x32xf32>
    %194 = arith.mulf %193, %192 : vector<16x32xf32>
    %195 = arith.addf %188, %194 : vector<16x32xf32>
    %cst_77 = arith.constant 0.797884583 : f32
    %196 = vector.broadcast %cst_77 : f32 to vector<16x32xf32>
    %197 = arith.mulf %196, %195 : vector<16x32xf32>
    %198 = math.tanh %197 : vector<16x32xf32>
    %cst_78 = arith.constant 1.000000e+00 : f32
    %199 = vector.broadcast %cst_78 : f32 to vector<16x32xf32>
    %200 = arith.addf %199, %198 : vector<16x32xf32>
    %201 = arith.mulf %190, %200 : vector<16x32xf32>
    %202 = arith.truncf %201 : vector<16x32xf32> to vector<16x32xbf16>
    %203 = arith.index_cast %c1_i32 : i32 to index
    %c0_79 = arith.constant 0 : index
    %c0_80 = arith.constant 0 : index
    %204 = vector.load %arg13[%203, %c0_79, %c0_80] : memref<2x32x32xbf16, #tpu.memory_space<vmem>>, vector<1x32x32xbf16>
    %205 = vector.shape_cast %204 : vector<1x32x32xbf16> to vector<32x32xbf16>
    %cst_81 = arith.constant dense<0.000000e+00> : vector<16x32xf32>
    %206 = tpu.matmul %202, %205, %cst_81 {dimension_numbers = #tpu.dot_dimension_numbers<[1], [0], [0], [1], [0, 0, 1, 1], [], []>} : vector<16x32xbf16>, vector<32x32xbf16>, vector<16x32xf32> -> vector<16x32xf32>
    %207 = vector.extract_strided_slice %152 {offsets = [2, 0], sizes = [1, 32], strides = [1, 1]} : vector<3x32xf32> to vector<1x32xf32>
    %208 = vector.broadcast %207 : vector<1x32xf32> to vector<16x32xf32>
    %209 = arith.addf %206, %208 : vector<16x32xf32>
    %cst_82 = arith.constant 5.000000e-01 : f32
    %210 = vector.broadcast %cst_82 : f32 to vector<16x32xf32>
    %211 = arith.mulf %210, %209 : vector<16x32xf32>
    %212 = arith.mulf %209, %209 : vector<16x32xf32>
    %213 = arith.mulf %212, %209 : vector<16x32xf32>
    %cst_83 = arith.constant 4.471500e-02 : f32
    %214 = vector.broadcast %cst_83 : f32 to vector<16x32xf32>
    %215 = arith.mulf %214, %213 : vector<16x32xf32>
    %216 = arith.addf %209, %215 : vector<16x32xf32>
    %cst_84 = arith.constant 0.797884583 : f32
    %217 = vector.broadcast %cst_84 : f32 to vector<16x32xf32>
    %218 = arith.mulf %217, %216 : vector<16x32xf32>
    %219 = math.tanh %218 : vector<16x32xf32>
    %cst_85 = arith.constant 1.000000e+00 : f32
    %220 = vector.broadcast %cst_85 : f32 to vector<16x32xf32>
    %221 = arith.addf %220, %219 : vector<16x32xf32>
    %222 = arith.mulf %211, %221 : vector<16x32xf32>
    %223 = arith.addf %180, %222 : vector<16x32xf32>
    %c2_i32 = arith.constant 2 : i32
    %cst_86 = arith.constant dense<0.000000e+00> : vector<32xf32>
    %224 = vector.multi_reduction <add>, %223, %cst_86 [0] : vector<16x32xf32> to vector<32xf32>
    %225 = vector.shape_cast %224 : vector<32xf32> to vector<1x32xf32>
    %226 = arith.truncf %225 : vector<1x32xf32> to vector<1x32xbf16>
    %c0_87 = arith.constant 0 : index
    %c0_88 = arith.constant 0 : index
    %227 = vector.load %arg15[%c0_87, %c0_88] : memref<32x1xbf16, #tpu.memory_space<vmem>>, vector<32x1xbf16>
    %cst_89 = arith.constant dense<0.000000e+00> : vector<1x1xf32>
    %228 = tpu.matmul %226, %227, %cst_89 {dimension_numbers = #tpu.dot_dimension_numbers<[1], [0], [0], [1], [0, 0, 1, 1], [], []>} : vector<1x32xbf16>, vector<32x1xbf16>, vector<1x1xf32> -> vector<1x1xf32>
    %c0_90 = arith.constant 0 : index
    %c0_91 = arith.constant 0 : index
    %229 = vector.load %arg16[%c0_90, %c0_91] : memref<1x1xf32, #tpu.memory_space<vmem>>, vector<1x1xf32>
    %230 = arith.addf %228, %229 : vector<1x1xf32>
    %231 = vector.shape_cast %230 : vector<1x1xf32> to vector<1x1x1xf32>
    %c0_92 = arith.constant 0 : index
    %c0_93 = arith.constant 0 : index
    %c0_94 = arith.constant 0 : index
    %232 = vector.load %arg17[%c0_92, %c0_93, %c0_94] : memref<1x1x1xf32, #tpu.memory_space<vmem>>, vector<1x1x1xf32>
    tpu.vector_store %arg17[%c0_92, %c0_93, %c0_94], %231 {strides = array<i32>} : memref<1x1x1xf32, #tpu.memory_space<vmem>>, vector<1x1x1xf32>,
    return
  }
  func.func @transform_0(%arg0: i32) -> (i32, i32, i32) {
    %c0_i32 = arith.constant 0 : i32
    %c0_i32_0 = arith.constant 0 : i32
    %c0_i32_1 = arith.constant 0 : i32
    return %arg0, %c0_i32, %c0_i32_0 : i32, i32, i32
  }
  func.func @transform_1(%arg0: i32) -> (i32, i32, i32) {
    %c0_i32 = arith.constant 0 : i32
    %c0_i32_0 = arith.constant 0 : i32
    %c0_i32_1 = arith.constant 0 : i32
    return %arg0, %c0_i32, %c0_i32_0 : i32, i32, i32
  }
  func.func @transform_2(%arg0: i32) -> (i32, i32, i32) {
    %c0_i32 = arith.constant 0 : i32
    %c0_i32_0 = arith.constant 0 : i32
    %c0_i32_1 = arith.constant 0 : i32
    return %arg0, %c0_i32, %c0_i32_0 : i32, i32, i32
  }
  func.func @transform_3(%arg0: i32) -> (i32, i32, i32) {
    %c0_i32 = arith.constant 0 : i32
    %c0_i32_0 = arith.constant 0 : i32
    %c0_i32_1 = arith.constant 0 : i32
    return %arg0, %c0_i32, %c0_i32_0 : i32, i32, i32
  }
  func.func @transform_4(%arg0: i32) -> (i32, i32, i32) {
    %c0_i32 = arith.constant 0 : i32
    %c0_i32_0 = arith.constant 0 : i32
    %c0_i32_1 = arith.constant 0 : i32
    return %arg0, %c0_i32, %c0_i32_0 : i32, i32, i32
  }
  func.func @transform_5(%arg0: i32) -> (i32, i32) {
    %c0_i32 = arith.constant 0 : i32
    %c0_i32_0 = arith.constant 0 : i32
    %c0_i32_1 = arith.constant 0 : i32
    return %c0_i32, %c0_i32_0 : i32, i32
  }
  func.func @transform_6(%arg0: i32) -> (i32, i32) {
    %c0_i32 = arith.constant 0 : i32
    %c0_i32_0 = arith.constant 0 : i32
    %c0_i32_1 = arith.constant 0 : i32
    return %c0_i32, %c0_i32_0 : i32, i32
  }
  func.func @transform_7(%arg0: i32) -> (i32, i32) {
    %c0_i32 = arith.constant 0 : i32
    %c0_i32_0 = arith.constant 0 : i32
    %c0_i32_1 = arith.constant 0 : i32
    return %c0_i32, %c0_i32_0 : i32, i32
  }
  func.func @transform_8(%arg0: i32) -> (i32, i32) {
    %c0_i32 = arith.constant 0 : i32
    %c0_i32_0 = arith.constant 0 : i32
    %c0_i32_1 = arith.constant 0 : i32
    return %c0_i32, %c0_i32_0 : i32, i32
  }
  func.func @transform_9(%arg0: i32) -> (i32, i32) {
    %c0_i32 = arith.constant 0 : i32
    %c0_i32_0 = arith.constant 0 : i32
    %c0_i32_1 = arith.constant 0 : i32
    return %c0_i32, %c0_i32_0 : i32, i32
  }
  func.func @transform_10(%arg0: i32) -> (i32, i32, i32) {
    %c0_i32 = arith.constant 0 : i32
    %c0_i32_0 = arith.constant 0 : i32
    %c0_i32_1 = arith.constant 0 : i32
    %c0_i32_2 = arith.constant 0 : i32
    return %c0_i32, %c0_i32_0, %c0_i32_1 : i32, i32, i32
  }
  func.func @transform_11(%arg0: i32) -> (i32, i32, i32) {
    %c0_i32 = arith.constant 0 : i32
    %c0_i32_0 = arith.constant 0 : i32
    %c0_i32_1 = arith.constant 0 : i32
    %c0_i32_2 = arith.constant 0 : i32
    return %c0_i32, %c0_i32_0, %c0_i32_1 : i32, i32, i32
  }
  func.func @transform_12(%arg0: i32) -> (i32, i32, i32) {
    %c0_i32 = arith.constant 0 : i32
    %c0_i32_0 = arith.constant 0 : i32
    %c0_i32_1 = arith.constant 0 : i32
    %c0_i32_2 = arith.constant 0 : i32
    return %c0_i32, %c0_i32_0, %c0_i32_1 : i32, i32, i32
  }
  func.func @transform_13(%arg0: i32) -> (i32, i32, i32) {
    %c0_i32 = arith.constant 0 : i32
    %c0_i32_0 = arith.constant 0 : i32
    %c0_i32_1 = arith.constant 0 : i32
    %c0_i32_2 = arith.constant 0 : i32
    return %c0_i32, %c0_i32_0, %c0_i32_1 : i32, i32, i32
  }
  func.func @transform_14(%arg0: i32) -> (i32, i32) {
    %c0_i32 = arith.constant 0 : i32
    %c0_i32_0 = arith.constant 0 : i32
    %c0_i32_1 = arith.constant 0 : i32
    return %c0_i32, %c0_i32_0 : i32, i32
  }
  func.func @transform_15(%arg0: i32) -> (i32, i32) {
    %c0_i32 = arith.constant 0 : i32
    %c0_i32_0 = arith.constant 0 : i32
    %c0_i32_1 = arith.constant 0 : i32
    return %c0_i32, %c0_i32_0 : i32, i32
  }
  func.func @transform_16(%arg0: i32) -> (i32, i32, i32) {
    %c0_i32 = arith.constant 0 : i32
    %c0_i32_0 = arith.constant 0 : i32
    %c0_i32_1 = arith.constant 0 : i32
    return %arg0, %c0_i32, %c0_i32_0 : i32, i32, i32
  }
}

</mosaic_0001>

<bundles_post_ra>
// kernel: net_forward.1
= control target key start
LH: loop header
LB: loop body
LE: loop exit
PB: predicated region body
PF: predicated region fallthrough
CT: control target
= control target key end

     0   :  { %s1827_s23 = smov 0   ;;  %s2113_s0 = inlined_call_operand.vmem [shape: s32[8,16,1], index: 0, kind: input, shape index: {}]   ;;  %s2114_s1 = inlined_call_operand.vmem [shape: s32[8,32,1], index: 1, kind: input, shape index: {}]   ;;  %s2115_s2 = inlined_call_operand.vmem [shape: s32[8,32,1], index: 2, kind: input, shape index: {}]   ;;  %s2116_s3 = inlined_call_operand.vmem [shape: s32[8,1,32], index: 3, kind: input, shape index: {}]   ;;  %s2117_s4 = inlined_call_operand.vmem [shape: f32[8,32,8], index: 4, kind: input, shape index: {}]   ;;  %s2118_s5 = inlined_call_operand.vmem [shape: bf16[10,32], index: 5, kind: input, shape index: {}]   ;;  %s2119_s6 = inlined_call_operand.vmem [shape: bf16[6,32], index: 6, kind: input, shape index: {}]   ;;  %s2120_s7 = inlined_call_operand.vmem [shape: bf16[8,32], index: 7, kind: input, shape index: {}]   ;;  %s2121_s8 = inlined_call_operand.vmem [shape: bf16[32,32], index: 8, kind: input, shape index: {}]   ;;  %s2122_s9 = inlined_call_operand.vmem [shape: f32[2,32], index: 9, kind: input, shape index: {}]   ;;  %s2123_s10 = inlined_call_operand.vmem [shape: bf16[2,32,32], index: 10, kind: input, shape index: {}]   ;;  %s2124_s11 = inlined_call_operand.vmem [shape: bf16[2,32,32], index: 11, kind: input, shape index: {}]   ;;  %s2125_s12 = inlined_call_operand.vmem [shape: bf16[2,32,32], index: 12, kind: input, shape index: {}]   ;;  %s2126_s13 = inlined_call_operand.vmem [shape: f32[2,3,32], index: 13, kind: input, shape index: {}]   ;;  %s2127_s14 = inlined_call_operand.vmem [shape: bf16[32,1], index: 14, kind: input, shape index: {}]   ;;  %s2128_s15 = inlined_call_operand.<no memory space> [shape: f32[1,1], index: 15, kind: input, shape index: {}]   ;;  %s2129_s16 = inlined_call_operand.vmem [shape: f32[8,1,1], index: 16, kind: output, shape index: {}]  }
   0x1   :  { %2130 = sst [smem:[#allocation3_spill]] %s2113_s0  ;;  %v21_v0 = vstv %s2128_s15 }
   0x2   :  { %22 = vst [vmem:[#allocation2] sm:$0x1] %v21_v0 }
   0x3 LB: > { %s1514_s24 = sadd.s32 4294967295, %s1735_s23   ;;  %p1518_p0 = scmp.ge.s32.totalorder %s1735_s23, 1  ;;  %s1735_s23 = sphi %s1827_s23, %s28_s23  }
   0x4   : > { %p502_p1 = scmp.lt.s32.totalorder %s1735_s23, 9 }
   0x6   : > { %p503_p2 = pnand %p1518_p0, %p502_p1 }
   0x7   : > { %p568_p3 = scmp.lt.s32.totalorder (!%p503_p2), %s1514_s24, 7  ;;  %s2131_s0 = sld [smem:[#allocation3_spill]] (!%p503_p2) }
   0x8   : > { %506 = sbr.rel (%p503_p2) target bundleno = 2020 (0x7e4), region = 84 }
   0xd   : > { %v1737_v1 = vmov 0   ;;  %s2133_s24 = smov (!%p568_p3, %s1514_s24), 7  ;;  %v1531_v12 = vld [vmem:[%s2118_s5] sm:$0xf]  ;;  %v1648_v13 = vld [vmem:[%s2118_s5] sm:$0x10]  ;;  %v610_v23 = vlaneseq }
   0xe   : > { %1676 = vset.pattern.permute.xlu1 %v1737_v1  ;;  %1675 = vset.pattern.permute.xlu0 %v1737_v1  ;;  %s1838_s15 = sshll.u32 %s2133_s24, 5  ;;  %s1644_s25 = sshll.u32 %s2133_s24, 4  ;;  %v1532_v14 = vor.u32 %v1648_v13, %v1531_v12  ;;  %vm636_vm0 = vcmask 1044480   ;;  %v680_v15 = vld [vmem:[%s2119_s6] sm:$0x7]  ;;  %vm688_vm1 = vcmask 1042432  }
   0xf   : > { %1677 = vset.pattern.permute.xlu2 %v1737_v1  ;;  %s577_s28 = scalar_lea.vmem %s2114_s1, %s1838_s15  ;;  %s572_s17 = scalar_lea.vmem %s2131_s0, %s1644_s25  ;;  %v690_v17 = vsel %vm688_vm1, %v680_v15, 0  ;;  %v752_v18 = vld [vmem:[%s2120_s7] sm:$0xf]  ;;  %vm761_vm2 = vcmask 1043456   ;;  %vm754_vm3 = vcmask 64512   ;;  %v1870_v26 = vand.u32 127, %v610_v23 }
  0x10   : > { %v597_v2 = vld [vmem:[%s577_s28] sm:$0xff]  ;;  %s582_s20 = scalar_lea.vmem %s2115_s2, %s1838_s15  ;;  %v598_v5 = vld [vmem:[%s577_s28 + $0x8] sm:$0xff]  ;;  %v600_v8 = vld [vmem:[%s577_s28 + $0x18] sm:$0xff]  ;;  %v638_v16 = vsel %vm636_vm0, %v1532_v14, 0  ;;  %699 = vmatpush.bf16.msra.mxu1 %v690_v17  ;;  %s590_s0 = scalar_lea.vmem %s2117_s4, %s1838_s15  ;;  %v763_v21 = vsel %vm761_vm2, %v752_v18, 0  ;;  %v1738_v27 = vmov 0.0  }
  0x11   : > { %v595_v3 = vld [vmem:[%s572_s17] sm:$0xff]  ;;  %655 = vperm.xlu1 %1676, %v597_v2   ;;  %v596_v6 = vld [vmem:[%s572_s17 + $0x8] sm:$0xff]  ;;  %v599_v9 = vld [vmem:[%s577_s28 + $0x10] sm:$0xff]  ;;  %647 = vmatpush.bf16.msra.mxu0 %v638_v16  ;;  %vm632_vm8 = vcmask 80896   ;;  %vm681_vm9 = vcmask 48128   ;;  %vm903_vm14 = vcmask 130048   ;;  %s585_s17 = scalar_lea.vmem %s2116_s3, %s2133_s24  ;;  %s593_s25 = scalar_lea.vmem %s2129_s16, %s2133_s24 }
  0x12   : > { %613 = vperm.xlu0 %1675, %v595_v3   ;;  %v601_v4 = vld [vmem:[%s582_s20] sm:$0xff]  ;;  %v602_v7 = vld [vmem:[%s582_s20 + $0x8] sm:$0xff]  ;;  %v603_v10 = vld [vmem:[%s582_s20 + $0x10] sm:$0xff]  ;;  %772 = vmatpush.bf16.msra.mxu2 %v763_v21  ;;  %vm839_vm1 = vcmask 261120  }
  0x13   : > { %712 = vperm.xlu2 %1677, %v601_v4   ;;  %v604_v11 = vld [vmem:[%s582_s20 + $0x18] sm:$0xff]  ;;  %v606_v19 = vld [vmem:[%s590_s0] sm:$0xff]  ;;  %v607_v20 = vld [vmem:[%s590_s0 + $0x8] sm:$0xff] }
  0x14   : > { %v750_v22 = vpack.c.bf16 %v607_v20, %v606_v19  ;;  %v608_v36 = vld [vmem:[%s590_s0 + $0x10] sm:$0xff]  ;;  %v609_v37 = vld [vmem:[%s590_s0 + $0x18] sm:$0xff]  ;;  %v1678_v45 = vld [vmem:[%s2122_s9] ss:$0 sm:$0xff] }
  0x15   : > { %v751_v38 = vpack.c.bf16 %v609_v37, %v608_v36  ;;  %v1650_v50 = vld [vmem:[%s2121_s8 + $0x8] sm:$0xff]  ;;  %v1649_v53 = vld [vmem:[%s2121_s8] sm:$0xff] }
  0x16   : > { %1546 = vmatmul.msk.bf16.vlgmr.msra.gmra.mxu2 %vm754_vm3, %v750_v22  ;;  %852 = vmatpush.bf16.msra.mxu3 %v1650_v50 }
  0x19   : > { %658 = vperm.xlu1 %1676, %v598_v5  }
  0x1a   : > { %616 = vperm.xlu0 %1675, %v596_v6   ;;  %853 = vmatpush.bf16.msra.mxu3 %v1649_v53 }
  0x1b   : > { %715 = vperm.xlu2 %1677, %v602_v7  }
  0x21   : > { %664 = vperm.xlu1 %1676, %v600_v8  }
  0x22   : > { %661 = vperm.xlu0 %1675, %v599_v9  }
  0x23   : > { %718 = vperm.xlu2 %1677, %v603_v10  }
  0x26   : > { %1547 = vmatmul.msk.bf16.gmra.mxu2 %vm754_vm3, %v751_v38 }
  0x2a   : > { %721 = vperm.xlu0 %1675, %v604_v11  }
  0x6d   : > { %v713_v44 = vpop.permute.xlu2 %712 }
  0x6e   : > { %vm723_vm12 = vcmp.eq.s32.totalorder %v713_v44, %v1870_v26  ;;  %v1652_v44 = vld [vmem:[%s2123_s10 + $0x8] sm:$0xff] }
  0x6f   : > { %v1540_v59 = vsel %vm723_vm12, 1.0, %v1738_v27  ;;  %960 = vmatpush.bf16.msrb.mxu1 %v1652_v44 }
  0x75   : > { %v716_v52 = vpop.permute.xlu2 %715 }
  0x76   : > { %vm724_vm13 = vcmp.eq.s32.totalorder %v716_v52, %v1870_v26 }
  0x77   : > { %v1541_v60 = vsel %vm724_vm13, 1.0, %v1738_v27 }
  0x78   : > { %v1906_v1 = vpack.c.bf16 %v1541_v60, %v1540_v59 }
  0x7d   : > { %v719_v9 = vpop.permute.xlu2 %718 }
  0x7e   : > { %vm725_vm15 = vcmp.eq.s32.totalorder %v719_v9, %v1870_v26 }
  0x7f   : > { %v1542_v20 = vsel %vm725_vm15, 1.0, %v1738_v27 }
  0x83   : > { %v656_v24 = vpop.permute.xlu1 %655 }
  0x84   : > { %v614_v25 = vpop.permute.xlu0 %613  ;;  %vm666_vm4 = vcmp.eq.s32.totalorder %v656_v24, %v1870_v26 }
  0x85   : > { %vm618_vm5 = vcmp.eq.s32.totalorder %v614_v25, %v1870_v26  ;;  %v1534_v28 = vsel %vm666_vm4, 1.0, %v1738_v27  ;;  %vm1420_vm4 = vcmask 0  }
  0x86   : > { %v1527_v31 = vsel %vm618_vm5, 1.0, %v1738_v27 }
  0x8b   : > { %v659_v29 = vpop.permute.xlu1 %658 }
  0x8c   : > { %v617_v30 = vpop.permute.xlu0 %616  ;;  %vm667_vm6 = vcmp.eq.s32.totalorder %v659_v29, %v1870_v26 }
  0x8d   : > { %vm619_vm7 = vcmp.eq.s32.totalorder %v617_v30, %v1870_v26  ;;  %v1535_v32 = vsel %vm667_vm6, 1.0, %v1738_v27 }
  0x8e   : > { %v1528_v33 = vsel %vm619_vm7, 1.0, %v1738_v27  ;;  %v678_v34 = vpack.c.bf16 %v1535_v32, %v1534_v28 }
  0x8f   : > { %v624_v35 = vpack.c.bf16 %v1528_v33, %v1527_v31 }
  0x90   : > { %1538 = vmatmul.msk.bf16.vlgmr.msra.gmra.mxu1 %vm681_vm9, %v678_v34 }
  0x91   : > { %1533 = vmatmul.msk.bf16.vlgmr.msra.gmra.mxu0 %vm632_vm8, %v624_v35 }
  0x93   : > { %v665_v39 = vpop.permute.xlu1 %664 }
  0x94   : > { %v662_v40 = vpop.permute.xlu0 %661  ;;  %vm669_vm10 = vcmp.eq.s32.totalorder %v665_v39, %v1870_v26 }
  0x95   : > { %vm668_vm11 = vcmp.eq.s32.totalorder %v662_v40, %v1870_v26  ;;  %v1537_v41 = vsel %vm669_vm10, 1.0, %v1738_v27 }
  0x96   : > { %v1536_v42 = vsel %vm668_vm11, 1.0, %v1738_v27 }
  0x97   : > { %v679_v43 = vpack.c.bf16 %v1537_v41, %v1536_v42 }
  0x99   : > { %v774_v46 = vpop.f32.mrf.mxu2 }
  0x9a   : > { %v775_v48 = vadd.f32 %v1678_v45, %v774_v46 }
  0x9c   : > { %v788_v49 = vmul.f32 %v775_v48, %v775_v48  ;;  %v722_v10 = vpop.permute.xlu0 %721  ;;  %v784_v14 = vmul.f32 0.5, %v775_v48 }
  0x9d   : > { %vm726_vm0 = vcmp.eq.s32.totalorder %v722_v10, %v1870_v26 }
  0x9e   : > { %v792_v51 = vmul.f32 %v788_v49, %v775_v48  ;;  %v1543_v21 = vsel %vm726_vm0, 1.0, %v1738_v27 }
  0x9f   : > { %v1914_v30 = vpack.c.bf16 %v1543_v21, %v1542_v20 }
  0xa0   : > { %1539 = vmatmul.msk.bf16.gmra.mxu1 %vm681_vm9, %v679_v43  ;;  %v796_v54 = vmul.f32 0.044715, %v792_v51 }
  0xa1   : > { %v776_v55 = vpop.f32.mrf.mxu2 }
  0xa2   : > { %v777_v56 = vadd.f32 %v1678_v45, %v776_v55  ;;  %v800_v58 = vadd.f32 %v796_v54, %v775_v48 }
  0xa4   : > { %v789_v62 = vmul.f32 %v777_v56, %v777_v56  ;;  %v804_v63 = vmul.f32 0.7978846, %v800_v58  ;;  %v785_v18 = vmul.f32 0.5, %v777_v56 }
  0xa6   : > { %v793_v0 = vmul.f32 %v789_v62, %v777_v56  ;;  %1681 = vtanh.f32 %v804_v63 }
  0xa8   : > { %v797_v2 = vmul.f32 0.044715, %v793_v0 }
  0xa9   : > { %v779_v3 = vpop.f32.mrf.mxu2 }
  0xaa   : > { %v801_v4 = vadd.f32 %v797_v2, %v777_v56  ;;  %v780_v5 = vadd.f32 %v1678_v45, %v779_v3  ;;  %v1679_v3 = vld [vmem:[%s2122_s9 + $0x1] ss:$0 sm:$0xff] }
  0xac   : > { %v805_v6 = vmul.f32 0.7978846, %v801_v4  ;;  %v790_v7 = vmul.f32 %v780_v5, %v780_v5  ;;  %v1682_v8 = vpop.eup %1681  ;;  %v786_v36 = vmul.f32 0.5, %v780_v5  ;;  %v1950_v4 = vld [vmem:[%s2126_s13] sm:$0x7] }
  0xad   : > { %v812_v15 = vadd.f32 1.0, %v1682_v8 }
  0xae   : > { %1683 = vtanh.f32 %v805_v6  ;;  %v794_v11 = vmul.f32 %v790_v7, %v780_v5  ;;  %v935_v7 = vperm.slane %v1950_v4, 0 }
  0xaf   : > { %v816_v28 = vmul.f32 %v812_v15, %v784_v14 }
  0xb0   : > { %v798_v12 = vmul.f32 0.044715, %v794_v11 }
  0xb1   : > { %v781_v13 = vpop.f32.mrf.mxu2 }
  0xb2   : > { %v802_v16 = vadd.f32 %v798_v12, %v780_v5  ;;  %v782_v17 = vadd.f32 %v1678_v45, %v781_v13  ;;  %v1651_v45 = vld [vmem:[%s2123_s10] sm:$0xff] }
  0xb3   : > { %961 = vmatpush.bf16.msrb.mxu1 %v1651_v45 }
  0xb4   : > { %v1684_v19 = vpop.eup %1683  ;;  %v806_v22 = vmul.f32 0.7978846, %v802_v16  ;;  %v791_v24 = vmul.f32 %v782_v17, %v782_v17  ;;  %v787_v38 = vmul.f32 0.5, %v782_v17 }
  0xb5   : > { %v813_v25 = vadd.f32 1.0, %v1684_v19 }
  0xb6   : > { %v795_v29 = vmul.f32 %v791_v24, %v782_v17  ;;  %1685 = vtanh.f32 %v806_v22 }
  0xb7   : > { %v817_v31 = vmul.f32 %v813_v25, %v785_v18 }
  0xb8   : > { %v799_v26 = vmul.f32 0.044715, %v795_v29 }
  0xb9   : > { %v820_v32 = vpack.c.bf16 %v817_v31, %v816_v28 }
  0xba   : > { %v803_v33 = vadd.f32 %v799_v26, %v782_v17 }
  0xbb   : > { %1556 = vmatmul.msk.bf16.vlgmr.msra.gmra.mxu3 %vm839_vm1, %v820_v32 }
  0xbc   : > { %v807_v34 = vmul.f32 0.7978846, %v803_v33  ;;  %v1686_v35 = vpop.eup %1685 }
  0xbd   : > { %v814_v37 = vadd.f32 1.0, %v1686_v35 }
  0xbe   : > { %1687 = vtanh.f32 %v807_v34 }
  0xbf   : > { %v818_v41 = vmul.f32 %v814_v37, %v786_v36 }
  0xc4   : > { %v1688_v39 = vpop.eup %1687 }
  0xc5   : > { %v815_v40 = vadd.f32 1.0, %v1688_v39 }
  0xc7   : > { %v819_v42 = vmul.f32 %v815_v40, %v787_v38 }
  0xc9   : > { %v821_v43 = vpack.c.bf16 %v819_v42, %v818_v41 }
  0xcb   : > { %1557 = vmatmul.msk.bf16.gmra.mxu3 %vm839_vm1, %v821_v43 }
 0x10d   : > { %v1926_v46 = vpop.f32.mrf.mxu1 }
 0x10e   : > { %v1890_v47 = vpop.f32.mrf.mxu0 }
 0x115   : > { %v1928_v49 = vpop.f32.mrf.mxu1 }
 0x116   : > { %v1900_v57 = vpop.f32.mrf.mxu0 }
 0x117   : > { %v902_v61 = vpack.c.bf16 %v1900_v57, %v1890_v47 }
 0x119   : > { %917 = vmatpush.bf16.msrb.mxu0 %v902_v61 }
 0x11c   : > { %1558 = vmatmul.msk.bf16.vlgmr.msrb.gmra.mxu0 %vm903_vm14, %v1906_v1 }
 0x11d   : > { %v1933_v54 = vpop.f32.mrf.mxu1 }
 0x125   : > { %v1935_v56 = vpop.f32.mrf.mxu1 }
 0x12c   : > { %1559 = vmatmul.msk.bf16.gmra.mxu0 %vm903_vm14, %v1914_v30 }
 0x13e   : > { %v855_v62 = vpop.f32.mrf.mxu3 }
 0x13f   : > { %v1965_v14 = vadd.f32 %v1679_v3, %v855_v62 }
 0x141   : > { %v869_v20 = vmul.f32 %v1965_v14, %v1965_v14 }
 0x143   : > { %v873_v32 = vmul.f32 %v869_v20, %v1965_v14  ;;  %v738_v20 = vshrl.u32 %v610_v23, 7  ;;  %v865_v23 = vmul.f32 0.5, %v1965_v14 }
 0x145   : > { %v877_v40 = vmul.f32 0.044715, %v873_v32 }
 0x146   : > { %v857_v63 = vpop.f32.mrf.mxu3 }
 0x147   : > { %v1959_v11 = vadd.f32 %v1679_v3, %v857_v63 }
 0x149   : > { %v870_v17 = vmul.f32 %v1959_v11, %v1959_v11 }
 0x14b   : > { %v874_v28 = vmul.f32 %v870_v17, %v1959_v11 }
 0x14d   : > { %v878_v36 = vmul.f32 0.044715, %v874_v28 }
 0x14e   : > { %v860_v0 = vpop.f32.mrf.mxu3 }
 0x14f   : > { %v1952_v6 = vadd.f32 %v1679_v3, %v860_v0 }
 0x151   : > { %v871_v12 = vmul.f32 %v1952_v6, %v1952_v6 }
 0x153   : > { %v875_v18 = vmul.f32 %v871_v12, %v1952_v6 }
 0x155   : > { %v879_v29 = vmul.f32 0.044715, %v875_v18  ;;  %v867_v18 = vmul.f32 0.5, %v1952_v6 }
 0x156   : > { %v862_v5 = vpop.f32.mrf.mxu3 }
 0x157   : > { %v1955_v8 = vadd.f32 %v1679_v3, %v862_v5  ;;  %v883_v37 = vadd.f32 %v879_v29, %v1952_v6 }
 0x159   : > { %v872_v15 = vmul.f32 %v1955_v8, %v1955_v8 }
 0x15b   : > { %v876_v21 = vmul.f32 %v872_v15, %v1955_v8 }
 0x15d   : > { %v880_v33 = vmul.f32 0.044715, %v876_v21 }
 0x15f   : > { %v884_v41 = vadd.f32 %v880_v33, %v1955_v8 }
 0x199   : > { %v919_v48 = vpop.f32.mrf.mxu0 }
 0x19a   : > { %v920_v51 = vadd.f32 %v919_v48, %v1926_v46  ;;  %v882_v48 = vadd.f32 %v878_v36, %v1959_v11 }
 0x1a1   : > { %v921_v50 = vpop.f32.mrf.mxu0 }
 0x1a2   : > { %v922_v52 = vadd.f32 %v921_v50, %v1928_v49  ;;  %v887_v50 = vmul.f32 0.7978846, %v883_v37 }
 0x1a4   : > { %v929_v53 = vpack.c.bf16 %v922_v52, %v920_v51  ;;  %1689 = vtanh.f32 %v887_v50 }
 0x1a6   : > { %1568 = vmatmul.msk.bf16.vlgmr.msrb.gmra.mxu1 %vm839_vm1, %v929_v53 }
 0x1a9   : > { %v924_v55 = vpop.f32.mrf.mxu0 }
 0x1aa   : > { %v925_v59 = vadd.f32 %v924_v55, %v1933_v54  ;;  %v881_v55 = vadd.f32 %v877_v40, %v1965_v14  ;;  %v1690_v5 = vpop.eup %1689 }
 0x1ac   : > { %v885_v0 = vmul.f32 0.7978846, %v881_v55  ;;  %v1654_v55 = vld [vmem:[%s2124_s11 + $0x8] sm:$0xff] }
 0x1ad   : > { %1061 = vmatpush.bf16.msrb.mxu3 %v1654_v55 }
 0x1b1   : > { %v926_v58 = vpop.f32.mrf.mxu0 }
 0x1b2   : > { %v927_v60 = vadd.f32 %v926_v58, %v1935_v56  ;;  %v888_v58 = vmul.f32 0.7978846, %v884_v41 }
 0x1b4   : > { %v930_v61 = vpack.c.bf16 %v927_v60, %v925_v59 }
 0x1b6   : > { %1569 = vmatmul.msk.bf16.gmra.mxu1 %vm839_vm1, %v930_v61  ;;  %v886_v61 = vmul.f32 0.7978846, %v882_v48 }
 0x223   : > { %v963_v2 = vpop.f32.mrf.mxu1 }
 0x224   : > { %v1963_v13 = vadd.f32 %v963_v2, %v935_v7 }
 0x226   : > { %v977_v19 = vmul.f32 %v1963_v13, %v1963_v13 }
 0x228   : > { %v981_v31 = vmul.f32 %v977_v19, %v1963_v13  ;;  %v895_v19 = vadd.f32 1.0, %v1690_v5 }
 0x22a   : > { %v985_v38 = vmul.f32 0.044715, %v981_v31  ;;  %v1994_v37 = vmul.f32 %v895_v19, %v867_v18 }
 0x22b   : > { %v965_v9 = vpop.f32.mrf.mxu1 }
 0x22c   : > { %v1957_v10 = vadd.f32 %v965_v9, %v935_v7  ;;  %v989_v51 = vadd.f32 %v985_v38, %v1963_v13 }
 0x22e   : > { %v978_v16 = vmul.f32 %v1957_v10, %v1957_v10  ;;  %v993_v62 = vmul.f32 0.7978846, %v989_v51  ;;  %v974_v33 = vmul.f32 0.5, %v1957_v10 }
 0x230   : > { %v982_v24 = vmul.f32 %v978_v16, %v1957_v10 }
 0x232   : > { %v986_v34 = vmul.f32 0.044715, %v982_v24 }
 0x233   : > { %v968_v22 = vpop.f32.mrf.mxu1 }
 0x234   : > { %v969_v25 = vadd.f32 %v968_v22, %v935_v7  ;;  %v990_v43 = vadd.f32 %v986_v34, %v1957_v10  ;;  %v868_v22 = vmul.f32 0.5, %v1955_v8  ;;  %v739_v8 = vadd.s32 8, %v738_v20 }
 0x235   : > { %v973_v10 = vmul.f32 0.5, %v1963_v13 }
 0x236   : > { %v979_v26 = vmul.f32 %v969_v25, %v969_v25  ;;  %v994_v59 = vmul.f32 0.7978846, %v990_v43  ;;  %v975_v28 = vmul.f32 0.5, %v969_v25 }
 0x238   : > { %v983_v35 = vmul.f32 %v979_v26, %v969_v25  ;;  %v866_v26 = vmul.f32 0.5, %v1959_v11 }
 0x23a   : > { %v987_v39 = vmul.f32 0.044715, %v983_v35 }
 0x23b   : > { %v970_v42 = vpop.f32.mrf.mxu1 }
 0x23c   : > { %v991_v44 = vadd.f32 %v987_v39, %v969_v25  ;;  %v971_v45 = vadd.f32 %v970_v42, %v935_v7  ;;  %v1680_v25 = vld [vmem:[%s585_s17] ss:$0 sm:$0xff] }
 0x23d   : > { %vm741_vm2 = vcmp.eq.s32.totalorder %v738_v20, %v1680_v25  ;;  %vm742_vm3 = vcmp.eq.s32.totalorder %v739_v8, %v1680_v25 }
 0x23e   : > { %v995_v52 = vmul.f32 0.7978846, %v991_v44  ;;  %v980_v53 = vmul.f32 %v971_v45, %v971_v45  ;;  %v976_v34 = vmul.f32 0.5, %v971_v45  ;;  %v1544_v13 = vsel %vm741_vm2, 1.0, %v1738_v27 }
 0x23f   : > { %v1545_v51 = vsel %vm742_vm3, 1.0, %v1738_v27 }
 0x240   : > { %v984_v60 = vmul.f32 %v980_v53, %v971_v45  ;;  %1691 = vtanh.f32 %v995_v52  ;;  %v2015_v53 = vpack.c.bf16 %v1545_v51, %v1544_v13 }
 0x241   : > { %1693 = vtanh.f32 %v888_v58  ;;  %v1653_v58 = vld [vmem:[%s2124_s11] sm:$0xff] }
 0x242   : > { %v988_v63 = vmul.f32 0.044715, %v984_v60  ;;  %1695 = vtanh.f32 %v994_v59  ;;  %1062 = vmatpush.bf16.msrb.mxu3 %v1653_v58 }
 0x243   : > { %1697 = vtanh.f32 %v886_v61 }
 0x244   : > { %v992_v2 = vadd.f32 %v988_v63, %v971_v45  ;;  %1699 = vtanh.f32 %v993_v62  ;;  %v1656_v63 = vld [vmem:[%s2125_s12 + $0x8] sm:$0xff] }
 0x245   : > { %1701 = vtanh.f32 %v885_v0  ;;  %1114 = vmatpush.bf16.msra.mxu0 %v1656_v63  ;;  %v1039_v0 = vperm.slane %v1950_v4, 1 }
 0x246   : > { %v996_v3 = vmul.f32 0.7978846, %v992_v2  ;;  %v1692_v7 = vpop.eup %1691  ;;  %v1655_v2 = vld [vmem:[%s2125_s12] sm:$0xff] }
 0x247   : > { %v1694_v9 = vpop.eup %1693  ;;  %v1003_v16 = vadd.f32 1.0, %v1692_v7 }
 0x248   : > { %1703 = vtanh.f32 %v996_v3  ;;  %v1696_v12 = vpop.eup %1695  ;;  %v896_v24 = vadd.f32 1.0, %v1694_v9 }
 0x249   : > { %v1698_v15 = vpop.eup %1697  ;;  %v1002_v29 = vadd.f32 1.0, %v1696_v12  ;;  %v1007_v36 = vmul.f32 %v1003_v16, %v975_v28  ;;  %1115 = vmatpush.bf16.msra.mxu0 %v1655_v2 }
 0x24a   : > { %v1700_v17 = vpop.eup %1699  ;;  %v894_v32 = vadd.f32 1.0, %v1698_v15  ;;  %v2002_v39 = vmul.f32 %v896_v24, %v868_v22 }
 0x24b   : > { %v1702_v21 = vpop.eup %1701  ;;  %v1001_v6 = vadd.f32 1.0, %v1700_v17  ;;  %v1006_v40 = vmul.f32 %v1002_v29, %v974_v33  ;;  %v1011_v41 = vmul.f32 %v1007_v36, %v1994_v37 }
 0x24c   : > { %v893_v38 = vadd.f32 1.0, %v1702_v21  ;;  %v2007_v43 = vmul.f32 %v894_v32, %v866_v26 }
 0x24d   : > { %v1005_v14 = vmul.f32 %v1001_v6, %v973_v10 }
 0x24e   : > { %v1704_v31 = vpop.eup %1703  ;;  %v2009_v45 = vmul.f32 %v893_v38, %v865_v23  ;;  %v1010_v48 = vmul.f32 %v1006_v40, %v2007_v43 }
 0x24f   : > { %v1004_v35 = vadd.f32 1.0, %v1704_v31 }
 0x250   : > { %v1009_v50 = vmul.f32 %v1005_v14, %v2009_v45 }
 0x251   : > { %v1008_v11 = vmul.f32 %v1004_v35, %v976_v34  ;;  %v1092_v35 = vperm.slane %v1950_v4, 2 }
 0x252   : > { %v1013_v52 = vpack.c.bf16 %v1010_v48, %v1009_v50 }
 0x253   : > { %v1012_v42 = vmul.f32 %v1008_v11, %v2002_v39 }
 0x255   : > { %v1014_v44 = vpack.c.bf16 %v1012_v42, %v1011_v41 }
 0x257   : > { %1024 = vmatpush.bf16.msrb.mxu2 %v1014_v44 }
 0x25b   : > { %1025 = vmatpush.bf16.msrb.mxu2 %v1013_v52 }
 0x25e   : > { %1570 = vmatmul.msk.bf16.vlgmr.msrb.gmra.mxu2 %vm839_vm1, %v2015_v53 }
 0x2e1   : > { %v1027_v59 = vpop.f32.mrf.mxu2 }
 0x2e2   : > { %v1032_v27 = vadd.f32 %v1027_v59, %v1890_v47 }
 0x2e9   : > { %v1029_v60 = vpop.f32.mrf.mxu2 }
 0x2ea   : > { %v1033_v61 = vadd.f32 %v1029_v60, %v1900_v57 }
 0x2ec   : > { %v1034_v62 = vpack.c.bf16 %v1033_v61, %v1032_v27 }
 0x2ee   : > { %1579 = vmatmul.msk.bf16.vlgmr.msrb.gmra.mxu3 %vm839_vm1, %v1034_v62 }
 0x371   : > { %v1064_v3 = vpop.f32.mrf.mxu3 }
 0x372   : > { %v1065_v5 = vadd.f32 %v1064_v3, %v1039_v0 }
 0x374   : > { %v1071_v47 = vmul.f32 %v1065_v5, %v1065_v5  ;;  %v1069_v29 = vmul.f32 0.5, %v1065_v5 }
 0x376   : > { %v1073_v7 = vmul.f32 %v1071_v47, %v1065_v5 }
 0x378   : > { %v1075_v57 = vmul.f32 0.044715, %v1073_v7 }
 0x379   : > { %v1066_v9 = vpop.f32.mrf.mxu3 }
 0x37a   : > { %v1077_v12 = vadd.f32 %v1075_v57, %v1065_v5  ;;  %v1067_v15 = vadd.f32 %v1066_v9, %v1039_v0  ;;  %v1658_v0 = vld [vmem:[%s2123_s10 + $0x18] sm:$0xff] }
 0x37b   : > { %1196 = vmatpush.bf16.msra.mxu3 %v1658_v0 }
 0x37c   : > { %v1072_v16 = vmul.f32 %v1067_v15, %v1067_v15  ;;  %v1079_v17 = vmul.f32 0.7978846, %v1077_v12  ;;  %v1070_v31 = vmul.f32 0.5, %v1067_v15 }
 0x37e   : > { %v1074_v18 = vmul.f32 %v1072_v16, %v1067_v15  ;;  %1705 = vtanh.f32 %v1079_v17 }
 0x380   : > { %v1076_v19 = vmul.f32 0.044715, %v1074_v18 }
 0x382   : > { %v1078_v20 = vadd.f32 %v1076_v19, %v1067_v15  ;;  %v2062_v15 = vld [vmem:[%s2126_s13 + $0x4] sm:$0x7] }
 0x384   : > { %v1080_v21 = vmul.f32 0.7978846, %v1078_v20  ;;  %v1706_v22 = vpop.eup %1705 }
 0x385   : > { %v1083_v24 = vadd.f32 1.0, %v1706_v22 }
 0x386   : > { %1707 = vtanh.f32 %v1080_v21 }
 0x387   : > { %v1085_v32 = vmul.f32 %v1083_v24, %v1069_v29 }
 0x38c   : > { %v1708_v28 = vpop.eup %1707 }
 0x38d   : > { %v1084_v26 = vadd.f32 1.0, %v1708_v28 }
 0x38f   : > { %v1086_v33 = vmul.f32 %v1084_v26, %v1070_v31 }
 0x391   : > { %v1087_v34 = vpack.c.bf16 %v1086_v33, %v1085_v32 }
 0x393   : > { %1588 = vmatmul.msk.bf16.vlgmr.msra.gmra.mxu0 %vm839_vm1, %v1087_v34 }
 0x410   : > { %v1117_v36 = vpop.f32.mrf.mxu0 }
 0x411   : > { %v1118_v6 = vadd.f32 %v1117_v36, %v1092_v35 }
 0x413   : > { %v1124_v23 = vmul.f32 %v1118_v6, %v1118_v6  ;;  %v1122_v51 = vmul.f32 0.5, %v1118_v6 }
 0x415   : > { %v1126_v38 = vmul.f32 %v1124_v23, %v1118_v6 }
 0x417   : > { %v1128_v8 = vmul.f32 0.044715, %v1126_v38 }
 0x418   : > { %v1119_v25 = vpop.f32.mrf.mxu0 }
 0x419   : > { %v1130_v11 = vadd.f32 %v1128_v8, %v1118_v6  ;;  %v1120_v10 = vadd.f32 %v1119_v25, %v1092_v35 }
 0x41b   : > { %v1132_v40 = vmul.f32 0.7978846, %v1130_v11  ;;  %v1125_v41 = vmul.f32 %v1120_v10, %v1120_v10  ;;  %v1123_v55 = vmul.f32 0.5, %v1120_v10 }
 0x41d   : > { %v1127_v42 = vmul.f32 %v1125_v41, %v1120_v10  ;;  %1709 = vtanh.f32 %v1132_v40 }
 0x41f   : > { %v1129_v14 = vmul.f32 0.044715, %v1127_v42 }
 0x421   : > { %v1131_v44 = vadd.f32 %v1129_v14, %v1120_v10 }
 0x423   : > { %v1133_v48 = vmul.f32 0.7978846, %v1131_v44  ;;  %v1710_v50 = vpop.eup %1709 }
 0x424   : > { %v1136_v13 = vadd.f32 1.0, %v1710_v50 }
 0x425   : > { %1711 = vtanh.f32 %v1133_v48 }
 0x426   : > { %v1138_v52 = vmul.f32 %v1136_v13, %v1122_v51 }
 0x428   : > { %v2037_v60 = vadd.f32 %v1138_v52, %v1032_v27  ;;  %v1657_v27 = vld [vmem:[%s2123_s10 + $0x10] sm:$0xff] }
 0x429   : > { %1197 = vmatpush.bf16.msra.mxu3 %v1657_v27 }
 0x42b   : > { %v1712_v4 = vpop.eup %1711 }
 0x42c   : > { %v1137_v58 = vadd.f32 1.0, %v1712_v4 }
 0x42e   : > { %v1139_v59 = vmul.f32 %v1137_v58, %v1123_v55 }
 0x430   : > { %v2039_v62 = vadd.f32 %v1139_v59, %v1033_v61 }
 0x432   : > { %v1144_v63 = vpack.c.bf16 %v2039_v62, %v2037_v60 }
 0x434   : > { %1152 = vmatpush.bf16.msra.mxu2 %v1144_v63 }
 0x437   : > { %1590 = vmatmul.msk.bf16.vlgmr.msra.gmra.mxu2 %vm903_vm14, %v1906_v1 }
 0x447   : > { %1591 = vmatmul.msk.bf16.gmra.mxu2 %vm903_vm14, %v1914_v30 }
 0x4ba   : > { %v1154_v61 = vpop.f32.mrf.mxu2 }
 0x4bb   : > { %v1155_v3 = vadd.f32 %v1154_v61, %v1926_v46  ;;  %v1171_v46 = vperm.slane %v2062_v15, 0 }
 0x4c2   : > { %v1156_v2 = vpop.f32.mrf.mxu2 }
 0x4c3   : > { %v1157_v5 = vadd.f32 %v1156_v2, %v1928_v49 }
 0x4c5   : > { %v1164_v1 = vpack.c.bf16 %v1157_v5, %v1155_v3 }
 0x4c7   : > { %1604 = vmatmul.msk.bf16.vlgmr.msra.gmra.mxu3 %vm839_vm1, %v1164_v1 }
 0x4ca   : > { %v1159_v30 = vpop.f32.mrf.mxu2 }
 0x4cb   : > { %v1160_v7 = vadd.f32 %v1159_v30, %v1933_v54  ;;  %v1660_v30 = vld [vmem:[%s2124_s11 + $0x18] sm:$0xff] }
 0x4cc   : > { %1295 = vmatpush.bf16.msra.mxu1 %v1660_v30 }
 0x4d2   : > { %v1161_v47 = vpop.f32.mrf.mxu2 }
 0x4d3   : > { %v1162_v57 = vadd.f32 %v1161_v47, %v1935_v56 }
 0x4d5   : > { %v1165_v9 = vpack.c.bf16 %v1162_v57, %v1160_v7  ;;  %v1662_v7 = vld [vmem:[%s2125_s12 + $0x18] sm:$0xff]  ;;  %v1273_v57 = vperm.slane %v2062_v15, 1 }
 0x4d7   : > { %1605 = vmatmul.msk.bf16.gmra.mxu3 %vm839_vm1, %v1165_v9 }
 0x54a   : > { %v1199_v12 = vpop.f32.mrf.mxu3 }
 0x54b   : > { %v1200_v17 = vadd.f32 %v1199_v12, %v1171_v46 }
 0x54d   : > { %v1213_v19 = vmul.f32 %v1200_v17, %v1200_v17  ;;  %v1209_v58 = vmul.f32 0.5, %v1200_v17 }
 0x54f   : > { %v1217_v56 = vmul.f32 %v1213_v19, %v1200_v17 }
 0x551   : > { %v1221_v29 = vmul.f32 0.044715, %v1217_v56 }
 0x552   : > { %v1201_v49 = vpop.f32.mrf.mxu3 }
 0x553   : > { %v1202_v16 = vadd.f32 %v1201_v49, %v1171_v46  ;;  %v1225_v35 = vadd.f32 %v1221_v29, %v1200_v17 }
 0x555   : > { %v1214_v18 = vmul.f32 %v1202_v16, %v1202_v16  ;;  %v1229_v8 = vmul.f32 0.7978846, %v1225_v35  ;;  %v1210_v13 = vmul.f32 0.5, %v1202_v16 }
 0x557   : > { %v1218_v54 = vmul.f32 %v1214_v18, %v1202_v16 }
 0x559   : > { %v1222_v24 = vmul.f32 0.044715, %v1218_v54 }
 0x55a   : > { %v1204_v20 = vpop.f32.mrf.mxu3 }
 0x55b   : > { %v1205_v21 = vadd.f32 %v1204_v20, %v1171_v46  ;;  %v1226_v32 = vadd.f32 %v1222_v24, %v1202_v16 }
 0x55d   : > { %v1215_v22 = vmul.f32 %v1205_v21, %v1205_v21  ;;  %v1230_v23 = vmul.f32 0.7978846, %v1226_v32  ;;  %v1211_v44 = vmul.f32 0.5, %v1205_v21 }
 0x55f   : > { %v1219_v28 = vmul.f32 %v1215_v22, %v1205_v21 }
 0x561   : > { %v1223_v31 = vmul.f32 0.044715, %v1219_v28 }
 0x562   : > { %v1206_v26 = vpop.f32.mrf.mxu3 }
 0x563   : > { %v1227_v33 = vadd.f32 %v1223_v31, %v1205_v21  ;;  %v1207_v34 = vadd.f32 %v1206_v26, %v1171_v46 }
 0x565   : > { %v1231_v36 = vmul.f32 0.7978846, %v1227_v33  ;;  %v1216_v6 = vmul.f32 %v1207_v34, %v1207_v34  ;;  %v1212_v4 = vmul.f32 0.5, %v1207_v34 }
 0x567   : > { %v1220_v38 = vmul.f32 %v1216_v6, %v1207_v34  ;;  %1713 = vtanh.f32 %v1231_v36  ;;  %v1327_v36 = vperm.slane %v2062_v15, 2 }
 0x568   : > { %1715 = vtanh.f32 %v1230_v23 }
 0x569   : > { %v1224_v25 = vmul.f32 0.044715, %v1220_v38  ;;  %1717 = vtanh.f32 %v1229_v8 }
 0x56b   : > { %v1228_v11 = vadd.f32 %v1224_v25, %v1207_v34  ;;  %v1664_v25 = vld [vmem:[%s2127_s14 + $0x8] sm:$0xff] }
 0x56d   : > { %v1232_v10 = vmul.f32 0.7978846, %v1228_v11  ;;  %v1714_v40 = vpop.eup %1713 }
 0x56e   : > { %v1716_v41 = vpop.eup %1715  ;;  %v1239_v42 = vadd.f32 1.0, %v1714_v40 }
 0x56f   : > { %1719 = vtanh.f32 %v1232_v10  ;;  %v1718_v14 = vpop.eup %1717  ;;  %v1238_v48 = vadd.f32 1.0, %v1716_v41  ;;  %v1663_v10 = vld [vmem:[%s2127_s14] sm:$0xff] }
 0x570   : > { %v1243_v51 = vmul.f32 %v1239_v42, %v1211_v44  ;;  %v1237_v55 = vadd.f32 1.0, %v1718_v14 }
 0x571   : > { %v1242_v63 = vmul.f32 %v1238_v48, %v1210_v13 }
 0x572   : > { %v1247_v0 = vmul.f32 %v1243_v51, %v1994_v37  ;;  %v1241_v61 = vmul.f32 %v1237_v55, %v1209_v58  ;;  %v1659_v37 = vld [vmem:[%s2124_s11 + $0x10] sm:$0xff] }
 0x573   : > { %v1246_v3 = vmul.f32 %v1242_v63, %v2007_v43  ;;  %1296 = vmatpush.bf16.msra.mxu1 %v1659_v37 }
 0x574   : > { %v1245_v5 = vmul.f32 %v1241_v61, %v2009_v45 }
 0x575   : > { %v1720_v50 = vpop.eup %1719 }
 0x576   : > { %v1240_v52 = vadd.f32 1.0, %v1720_v50  ;;  %v1249_v1 = vpack.c.bf16 %v1246_v3, %v1245_v5 }
 0x577   : > { %1413 = vmatpush.bf16.msrb.mxu1 %v1664_v25 }
 0x578   : > { %v1244_v59 = vmul.f32 %v1240_v52, %v1212_v4 }
 0x57a   : > { %v1248_v27 = vmul.f32 %v1244_v59, %v2002_v39 }
 0x57b   : > { %1414 = vmatpush.bf16.msrb.mxu1 %v1663_v10 }
 0x57c   : > { %v1250_v2 = vpack.c.bf16 %v1248_v27, %v1247_v0 }
 0x57e   : > { %1257 = vmatpush.bf16.msrb.mxu0 %v1250_v2 }
 0x582   : > { %1258 = vmatpush.bf16.msrb.mxu0 %v1249_v1 }
 0x585   : > { %1606 = vmatmul.msk.bf16.vlgmr.msrb.gmra.mxu0 %vm839_vm1, %v2015_v53 }
 0x586   : > { %1349 = vmatpush.bf16.msra.mxu0 %v1662_v7 }
 0x602   : > { %v1260_v39 = vpop.f32.mrf.mxu0 }
 0x603   : > { %v2078_v47 = vadd.f32 %v1260_v39, %v2037_v60  ;;  %v1661_v60 = vld [vmem:[%s2125_s12 + $0x10] sm:$0xff] }
 0x604   : > { %1350 = vmatpush.bf16.msra.mxu0 %v1661_v60 }
 0x60a   : > { %v1262_v43 = vpop.f32.mrf.mxu0 }
 0x60b   : > { %v2081_v45 = vadd.f32 %v1262_v43, %v2039_v62 }
 0x60d   : > { %v1267_v53 = vpack.c.bf16 %v2081_v45, %v2078_v47 }
 0x60f   : > { %1619 = vmatmul.msk.bf16.vlgmr.msra.gmra.mxu1 %vm839_vm1, %v1267_v53 }
 0x68c   : > { %v1298_v9 = vpop.f32.mrf.mxu1 }
 0x68d   : > { %v1299_v62 = vadd.f32 %v1298_v9, %v1273_v57 }
 0x68f   : > { %v1305_v12 = vmul.f32 %v1299_v62, %v1299_v62  ;;  %v1303_v31 = vmul.f32 0.5, %v1299_v62 }
 0x691   : > { %v1307_v46 = vmul.f32 %v1305_v12, %v1299_v62 }
 0x693   : > { %v1309_v49 = vmul.f32 0.044715, %v1307_v46 }
 0x694   : > { %v1300_v16 = vpop.f32.mrf.mxu1 }
 0x695   : > { %v1311_v17 = vadd.f32 %v1309_v49, %v1299_v62  ;;  %v1301_v18 = vadd.f32 %v1300_v16, %v1273_v57  ;;  %v1391_v57 = vld [vmem:[#allocation2] sm:$0x1] }
 0x697   : > { %v1306_v19 = vmul.f32 %v1301_v18, %v1301_v18  ;;  %v1313_v20 = vmul.f32 0.7978846, %v1311_v17  ;;  %v1304_v26 = vmul.f32 0.5, %v1301_v18 }
 0x699   : > { %v1308_v54 = vmul.f32 %v1306_v19, %v1301_v18  ;;  %1721 = vtanh.f32 %v1313_v20 }
 0x69b   : > { %v1310_v21 = vmul.f32 0.044715, %v1308_v54 }
 0x69d   : > { %v1312_v56 = vadd.f32 %v1310_v21, %v1301_v18 }
 0x69f   : > { %v1314_v22 = vmul.f32 0.7978846, %v1312_v56  ;;  %v1722_v24 = vpop.eup %1721 }
 0x6a0   : > { %v1317_v28 = vadd.f32 1.0, %v1722_v24 }
 0x6a1   : > { %1723 = vtanh.f32 %v1314_v22 }
 0x6a2   : > { %v1319_v33 = vmul.f32 %v1317_v28, %v1303_v31 }
 0x6a7   : > { %v1724_v29 = vpop.eup %1723 }
 0x6a8   : > { %v1318_v32 = vadd.f32 1.0, %v1724_v29 }
 0x6aa   : > { %v1320_v34 = vmul.f32 %v1318_v32, %v1304_v26 }
 0x6ac   : > { %v1321_v35 = vpack.c.bf16 %v1320_v34, %v1319_v33 }
 0x6ae   : > { %1632 = vmatmul.msk.bf16.vlgmr.msra.gmra.mxu0 %vm839_vm1, %v1321_v35 }
 0x72b   : > { %v1352_v6 = vpop.f32.mrf.mxu0 }
 0x72c   : > { %v1353_v23 = vadd.f32 %v1352_v6, %v1327_v36 }
 0x72e   : > { %v1359_v38 = vmul.f32 %v1353_v23, %v1353_v23  ;;  %v1357_v52 = vmul.f32 0.5, %v1353_v23 }
 0x730   : > { %v1361_v8 = vmul.f32 %v1359_v38, %v1353_v23 }
 0x732   : > { %v1363_v11 = vmul.f32 0.044715, %v1361_v8 }
 0x733   : > { %v1354_v40 = vpop.f32.mrf.mxu0 }
 0x734   : > { %v1365_v41 = vadd.f32 %v1363_v11, %v1353_v23  ;;  %v1355_v42 = vadd.f32 %v1354_v40, %v1327_v36 }
 0x736   : > { %v1367_v14 = vmul.f32 0.7978846, %v1365_v41  ;;  %v1360_v44 = vmul.f32 %v1355_v42, %v1355_v42  ;;  %v1358_v59 = vmul.f32 0.5, %v1355_v42 }
 0x738   : > { %1725 = vtanh.f32 %v1367_v14  ;;  %v1362_v15 = vmul.f32 %v1360_v44, %v1355_v42 }
 0x73a   : > { %v1364_v48 = vmul.f32 0.044715, %v1362_v15 }
 0x73c   : > { %v1366_v50 = vadd.f32 %v1364_v48, %v1355_v42 }
 0x73e   : > { %v1726_v13 = vpop.eup %1725  ;;  %v1368_v51 = vmul.f32 0.7978846, %v1366_v50 }
 0x73f   : > { %v1371_v4 = vadd.f32 1.0, %v1726_v13 }
 0x740   : > { %1727 = vtanh.f32 %v1368_v51 }
 0x741   : > { %v1373_v55 = vmul.f32 %v1371_v4, %v1357_v52 }
 0x743   : > { %v1375_v0 = vadd.f32 %v1373_v55, %v2078_v47 }
 0x745   : > { %v1377_v2 = vsel %vm839_vm1, %v1375_v0, 0.0 }
 0x746   : > { %v1728_v58 = vpop.eup %1727 }
 0x747   : > { %v1372_v63 = vadd.f32 1.0, %v1728_v58 }
 0x749   : > { %v1374_v27 = vmul.f32 %v1372_v63, %v1358_v59 }
 0x74b   : > { %v1376_v61 = vadd.f32 %v1374_v27, %v2081_v45 }
 0x74d   : > { %v1378_v3 = vsel %vm839_vm1, %v1376_v61, 0.0 }
 0x74e   : > { %v1379_v5 = vadd.f32 %v1378_v3, %v1377_v2 }
 0x750   : > { %v1380_v1 = vrot.slane %v1379_v5, 4 }
 0x752   : > { %v1381_v30 = vadd.f32 %v1380_v1, %v1379_v5 }
 0x754   : > { %v1382_v37 = vrot.slane %v1381_v30, 2 }
 0x756   : > { %v1383_v39 = vadd.f32 %v1382_v37, %v1381_v30 }
 0x758   : > { %v1384_v43 = vrot.slane %v1383_v39, 1 }
 0x75a   : > { %v1385_v53 = vadd.f32 %v1384_v43, %v1383_v39 }
 0x75c   : > { %v1386_v7 = vpack.c.bf16 %v1385_v53, %v1385_v53 }
 0x75e   : > { %1641 = vmatmul.msk.bf16.vlgmr.msrb.gmra.mxu1 %vm839_vm1, %v1386_v7 }
 0x7db   : > { %v1416_v47 = vpop.f32.mrf.mxu1 }
 0x7dc   : > { %v1417_v45 = vadd.f32 %v1416_v47, %v1391_v57 }
 0x7de   : > { %1421 = vst.msk [vmem:[%s593_s25] sm:$0x1] %vm1420_vm4, %v1417_v45 }
 0x7e3   : > { %v1418_v60 = vpop.f32.mrf.mxu1 }
 0x7e4 PF: > { %s28_s23 = sadd.s32 1, %s1735_s23  }
 0x7e5   : > { %p25_p4 = scmp.ge.s32.totalorder %s28_s23, 10  }
 0x7e7   :  { %27 = sbr.rel (!%p25_p4) target bundleno = 3 (0x3), region = 130 }

</bundles_post_ra>
